<compile_context>
chip_gen: v6e
topology: v6e:2x2x1
jax: 0.10.0
libtpu: 0.0.40
codegen_flags: <defaults>
</compile_context>

<pallas_src>
import functools
import math

import jax
import jax.numpy as jnp
import numpy as np
from jax import lax
from jax.experimental import pallas as pl
from jax.experimental.pallas import tpu as pltpu

EPS = 1e-6  # RMSNorm eps (matches the PyTorch module)

_PARALLEL1 = pltpu.CompilerParams(dimension_semantics=("parallel",))


def _m_tile(m):
    """Largest sublane-aligned row tile that evenly divides m (else full m)."""
    for t in (512, 256, 128, 64, 32, 16, 8):
        if m % t == 0:
            return t
    return m


# ----------------------------- shared helpers --------------------------------

def _rmsnorm(x, g):
    inv = lax.rsqrt(jnp.mean(x * x, axis=-1, keepdims=True) + EPS)
    return g * (x * inv)


def _mha_core(q, k, v, cos_q, sin_q, cos_k, sin_k, wo, *, num_heads, scale):
    """RoPE + softmax attention over all heads + fused out-projection.

    q: (Sq, D), k/v: (Sk, D) with D = H*dh lane-dense.  Heads are sliced with
    static lane slices; the attention scale is folded into q (RoPE is a
    rotation so scaling commutes).  Per-head contexts are re-concatenated on
    the lane axis so the out-projection is one full-width MXU matmul.
    """
    sq, D = q.shape
    dh = D // num_heads
    half = dh // 2

    # a @ b^T contracting the last dims (no explicit transpose materialized).
    dot_nt = functools.partial(
        lax.dot_general,
        dimension_numbers=(((1,), (1,)), ((), ())),
        preferred_element_type=jnp.float32)

    ctx_heads = []
    for h in range(num_heads):                                # static unroll
        lo = h * dh
        q1 = q[:, lo:lo + half] * scale
        q2 = q[:, lo + half:lo + dh] * scale
        k1, k2 = k[:, lo:lo + half], k[:, lo + half:lo + dh]
        # RoPE on the half-split representation (the cached cos/sin are
        # cat(freqs, freqs), so the two halves are identical):
        #   x_emb = [x1*c - x2*s, x2*c + x1*s]
        q1e, q2e = q1 * cos_q - q2 * sin_q, q2 * cos_q + q1 * sin_q
        k1e, k2e = k1 * cos_k - k2 * sin_k, k2 * cos_k + k1 * sin_k
        # q_emb . k_emb = q1e.k1e + q2e.k2e  (avoids a lane-axis concat)
        logits = dot_nt(q1e, k1e) + dot_nt(q2e, k2e)
        # TODO(synk): src/tgt masks (masked_fill with -inf) not wired in; the
        # exercised PyTorch path uses mask=None.
        m = jnp.max(logits, axis=-1, keepdims=True)
        p = jnp.exp(logits - m)
        wts = p * pl.reciprocal(jnp.sum(p, axis=-1, keepdims=True), approx=True)
        ctx_heads.append(jnp.dot(wts, v[:, lo:lo + dh],
                                 preferred_element_type=jnp.float32))
    ctx = jnp.concatenate(ctx_heads, axis=-1)                 # (Sq, D)
    return jnp.dot(ctx, wo, preferred_element_type=jnp.float32)


# ----------------------------- Pallas kernels --------------------------------

def _proj_kernel(*refs, normalize):
    """[optional RMSNorm] + matmul + bias, column-split into N outputs."""
    if normalize:
        x_ref, g_ref, w_ref, b_ref, *o_refs = refs
    else:
        x_ref, w_ref, b_ref, *o_refs = refs
        g_ref = None
    x = x_ref[...].astype(jnp.float32)                        # (Mt, Din)
    if normalize:
        x = _rmsnorm(x, g_ref[...])
    y = jnp.dot(x, w_ref[...], preferred_element_type=jnp.float32) + b_ref[...]
    dout = y.shape[-1] // len(o_refs)
    for i, o_ref in enumerate(o_refs):
        o_ref[...] = y[:, i * dout:(i + 1) * dout].astype(o_ref.dtype)


def _self_attn_kernel(x_ref, g_ref, qkv_w_ref, qkv_b_ref, cos_ref, sin_ref,
                      wo_ref, bo_ref, gamma_ref, o_ref, *, num_heads, scale):
    """RMSNorm + QKV proj + RoPE + attention + out-proj + LayerScale + residual."""
    x = x_ref[...].astype(jnp.float32)                        # (Sq, D)
    h = _rmsnorm(x, g_ref[...])
    qkv = (jnp.dot(h, qkv_w_ref[...], preferred_element_type=jnp.float32)
           + qkv_b_ref[...])                                  # (Sq, 3D)
    D = x.shape[-1]
    q, k, v = qkv[:, :D], qkv[:, D:2 * D], qkv[:, 2 * D:]
    cos, sin = cos_ref[...], sin_ref[...]                     # (Sq, dh//2)
    attn = _mha_core(q, k, v, cos, sin, cos, sin,
                     wo_ref[...].astype(jnp.float32),
                     num_heads=num_heads, scale=scale)
    o_ref[...] = (x + gamma_ref[...] * (attn + bo_ref[...])).astype(o_ref.dtype)


def _cross_attn_kernel(x_ref, g_ref, qw_ref, qb_ref, k_ref, v_ref,
                       cosq_ref, sinq_ref, cosk_ref, sink_ref,
                       wo_ref, bo_ref, gamma_ref, o_ref, *, num_heads, scale):
    """RMSNorm + Q proj + RoPE + cross-attention + out-proj + scale + residual."""
    x = x_ref[...].astype(jnp.float32)                        # (Sq, D)
    h = _rmsnorm(x, g_ref[...])
    q = jnp.dot(h, qw_ref[...], preferred_element_type=jnp.float32) + qb_ref[...]
    k = k_ref[...].astype(jnp.float32)                        # (Sk, D)
    v = v_ref[...].astype(jnp.float32)                        # (Sk, D)
    attn = _mha_core(q, k, v, cosq_ref[...], sinq_ref[...],
                     cosk_ref[...], sink_ref[...],
                     wo_ref[...].astype(jnp.float32),
                     num_heads=num_heads, scale=scale)
    o_ref[...] = (x + gamma_ref[...] * (attn + bo_ref[...])).astype(o_ref.dtype)


def _ffn_kernel(x_ref, g_ref, w1_ref, b1_ref, w2_ref, b2_ref, w3_ref, b3_ref,
                gamma_ref, o_ref):
    """RMSNorm + SwiGLU gate + down-projection + LayerScale + residual."""
    x = x_ref[...].astype(jnp.float32)                        # (Mt, D)
    h = _rmsnorm(x, g_ref[...])
    a = jnp.dot(h, w1_ref[...], preferred_element_type=jnp.float32) + b1_ref[...]
    g2 = jnp.dot(h, w2_ref[...], preferred_element_type=jnp.float32) + b2_ref[...]
    gated = a * jax.nn.sigmoid(g2)
    y = jnp.dot(gated, w3_ref[...], preferred_element_type=jnp.float32) + b3_ref[...]
    o_ref[...] = (x + gamma_ref[...] * y).astype(o_ref.dtype)


# ------------------------------ kernel wrappers -------------------------------

def fused_proj(x, w, b, *, norm_g=None, n_out=1):
    """x: (M, Din) -> tuple of n_out arrays (M, Dout) with optional fused RMSNorm.

    w: (Din, n_out*Dout), b: (1, n_out*Dout).  M is tiled; weights are a single
    block (fine at these shapes; production would tile N/K).
    """
    M, Din = x.shape
    Dtot = w.shape[1]
    dout = Dtot // n_out
    Mt = _m_tile(M)
    normalize = norm_g is not None

    in_specs = [pl.BlockSpec((Mt, Din), lambda i: (i, 0))]
    args = [x]
    if normalize:
        in_specs.append(pl.BlockSpec((1, Din), lambda i: (0, 0)))
        args.append(norm_g)
    in_specs += [pl.BlockSpec((Din, Dtot), lambda i: (0, 0)),
                 pl.BlockSpec((1, Dtot), lambda i: (0, 0))]
    args += [w, b]

    out_shape = tuple(jax.ShapeDtypeStruct((M, dout), x.dtype)
                      for _ in range(n_out))
    out_specs = tuple(pl.BlockSpec((Mt, dout), lambda i: (i, 0))
                      for _ in range(n_out))
    return pl.pallas_call(
        functools.partial(_proj_kernel, normalize=normalize),
        out_shape=out_shape,
        grid=(M // Mt,),
        in_specs=in_specs,
        out_specs=out_specs,
        compiler_params=_PARALLEL1,
    )(*args)


def self_attn_block(x, sa, norm_g, cos, sin, *, num_heads, batch, sq):
    """Fully fused self-attention block.  x: (batch*sq, D)."""
    M, D = x.shape
    dh = D // num_heads
    half = dh // 2
    # cos/sin caches are cat(freqs, freqs): ship only the (identical) first half.
    cq, sq_h = cos[:sq, :half], sin[:sq, :half]
    kern = functools.partial(_self_attn_kernel, num_heads=num_heads,
                             scale=1.0 / math.sqrt(dh))
    return pl.pallas_call(
        kern,
        out_shape=jax.ShapeDtypeStruct((M, D), x.dtype),
        grid=(batch,),
        in_specs=[pl.BlockSpec((sq, D), lambda b: (b, 0)),       # x (residual)
                  pl.BlockSpec((1, D), lambda b: (0, 0)),        # norm weight
                  pl.BlockSpec((D, 3 * D), lambda b: (0, 0)),    # Wqkv
                  pl.BlockSpec((1, 3 * D), lambda b: (0, 0)),    # bqkv
                  pl.BlockSpec((sq, half), lambda b: (0, 0)),    # cos
                  pl.BlockSpec((sq, half), lambda b: (0, 0)),    # sin
                  pl.BlockSpec((D, D), lambda b: (0, 0)),        # Wo
                  pl.BlockSpec((1, D), lambda b: (0, 0)),        # bo
                  pl.BlockSpec((1, D), lambda b: (0, 0))],       # gamma
        out_specs=pl.BlockSpec((sq, D), lambda b: (b, 0)),
        compiler_params=_PARALLEL1,
    )(x, norm_g, sa["qkv_w"], sa["qkv_b"], cq, sq_h,
      sa["o_w"], sa["o_b"], sa["gamma"])


def cross_attn_block(x, k, v, ca, norm_g, cos, sin, *, num_heads, batch, sq, sk):
    """Fully fused cross-attention block.

    x: (batch*sq, D);  k/v: (batch*sk, D) pre-projected enc_output.
    Grid over batch ('parallel' so the axis can shard across TensorCores).
    Note: sq/sk must be multiples of 8 (sublane-aligned blocks of the flat M axis).
    """
    M, D = x.shape
    dh = D // num_heads
    half = dh // 2
    cq, sq_h = cos[:sq, :half], sin[:sq, :half]
    ck, sk_h = cos[:sk, :half], sin[:sk, :half]
    kern = functools.partial(_cross_attn_kernel, num_heads=num_heads,
                             scale=1.0 / math.sqrt(dh))
    return pl.pallas_call(
        kern,
        out_shape=jax.ShapeDtypeStruct((M, D), x.dtype),
        grid=(batch,),
        in_specs=[pl.BlockSpec((sq, D), lambda b: (b, 0)),       # x (residual)
                  pl.BlockSpec((1, D), lambda b: (0, 0)),        # norm weight
                  pl.BlockSpec((D, D), lambda b: (0, 0)),        # Wq
                  pl.BlockSpec((1, D), lambda b: (0, 0)),        # bq
                  pl.BlockSpec((sk, D), lambda b: (b, 0)),       # k
                  pl.BlockSpec((sk, D), lambda b: (b, 0)),       # v
                  pl.BlockSpec((sq, half), lambda b: (0, 0)),    # cos_q
                  pl.BlockSpec((sq, half), lambda b: (0, 0)),    # sin_q
                  pl.BlockSpec((sk, half), lambda b: (0, 0)),    # cos_k
                  pl.BlockSpec((sk, half), lambda b: (0, 0)),    # sin_k
                  pl.BlockSpec((D, D), lambda b: (0, 0)),        # Wo
                  pl.BlockSpec((1, D), lambda b: (0, 0)),        # bo
                  pl.BlockSpec((1, D), lambda b: (0, 0))],       # gamma
        out_specs=pl.BlockSpec((sq, D), lambda b: (b, 0)),
        compiler_params=_PARALLEL1,
    )(x, norm_g, ca["q_w"], ca["q_b"], k, v, cq, sq_h, ck, sk_h,
      ca["o_w"], ca["o_b"], ca["gamma"])


def ffn_block(x, norm_g, fp):
    """Fused RMSNorm + FeedForward + LayerScale + residual.  x: (M, D)."""
    M, D = x.shape
    Dff = fp["w1"].shape[1]
    Mt = _m_tile(M)
    return pl.pallas_call(
        _ffn_kernel,
        out_shape=jax.ShapeDtypeStruct((M, D), x.dtype),
        grid=(M // Mt,),
        in_specs=[pl.BlockSpec((Mt, D), lambda i: (i, 0)),
                  pl.BlockSpec((1, D), lambda i: (0, 0)),
                  pl.BlockSpec((D, Dff), lambda i: (0, 0)),
                  pl.BlockSpec((1, Dff), lambda i: (0, 0)),
                  pl.BlockSpec((D, Dff), lambda i: (0, 0)),
                  pl.BlockSpec((1, Dff), lambda i: (0, 0)),
                  pl.BlockSpec((Dff, D), lambda i: (0, 0)),
                  pl.BlockSpec((1, D), lambda i: (0, 0)),
                  pl.BlockSpec((1, D), lambda i: (0, 0))],
        out_specs=pl.BlockSpec((Mt, D), lambda i: (i, 0)),
        compiler_params=_PARALLEL1,
    )(x, norm_g, fp["w1"], fp["b1"], fp["w2"], fp["b2"],
      fp["w3"], fp["b3"], fp["gamma"])


# --------------------------- Model forward (glue) -----------------------------

def decoder_layer(x, enc, p, cos, sin, num_heads, *, batch, sq, sk):
    # Self-attention block: one fully fused kernel.
    x = self_attn_block(x, p["self_attn"], p["norm1_w"], cos, sin,
                        num_heads=num_heads, batch=batch, sq=sq)

    # Cross-attention block: KV projection of enc_output + fused attention.
    ca = p["cross_attn"]
    k, v = fused_proj(enc, ca["kv_w"], ca["kv_b"], n_out=2)
    x = cross_attn_block(x, k, v, ca, p["norm2_w"], cos, sin,
                         num_heads=num_heads, batch=batch, sq=sq, sk=sk)

    # FeedForward block (fully fused).
    x = ffn_block(x, p["norm3_w"], p["ffn"])
    return x


def transformer_decoder(tokens, enc_output, params, num_heads):
    D = params["embed"].shape[1]
    B, S = tokens.shape
    Se = enc_output.shape[1]
    # TODO(synk): embedding gather has no clean Pallas equivalent here; it
    # stays as a plain-JAX gather (jnp.take).  Dropouts are identity (eval).
    x = jnp.take(params["embed"], tokens.reshape(-1), axis=0) * math.sqrt(D)
    enc2 = enc_output.reshape(B * Se, D)
    cos, sin = params["rope_cos"], params["rope_sin"]
    for lp in params["layers"]:
        x = decoder_layer(x, enc2, lp, cos, sin, num_heads,
                          batch=B, sq=S, sk=Se)
    (logits,) = fused_proj(x, params["out_w"], params["out_b"],
                           norm_g=params["norm_w"])
    return logits.reshape(B, S, -1)


# ----------------------------- Parameter init ---------------------------------

def init_params(key, d_model, num_heads, d_ff, num_layers, vocab_size, max_len):
    dh = d_model // num_heads
    keys = iter(jax.random.split(key, 128))

    def w(shape, scale=0.02):
        return scale * jax.random.normal(next(keys), shape, dtype=jnp.float32)

    def self_attn_p():
        return dict(qkv_w=w((d_model, 3 * d_model)), qkv_b=w((1, 3 * d_model)),
                    o_w=w((d_model, d_model)), o_b=w((1, d_model)),
                    gamma=1e-4 * jnp.ones((1, d_model), jnp.float32))

    def cross_attn_p():
        return dict(q_w=w((d_model, d_model)), q_b=w((1, d_model)),
                    kv_w=w((d_model, 2 * d_model)), kv_b=w((1, 2 * d_model)),
                    o_w=w((d_model, d_model)), o_b=w((1, d_model)),
                    gamma=1e-4 * jnp.ones((1, d_model), jnp.float32))

    layers = [dict(norm1_w=jnp.ones((1, d_model), jnp.float32),
                   norm2_w=jnp.ones((1, d_model), jnp.float32),
                   norm3_w=jnp.ones((1, d_model), jnp.float32),
                   self_attn=self_attn_p(),
                   cross_attn=cross_attn_p(),
                   ffn=dict(w1=w((d_model, d_ff)), b1=w((1, d_ff)),
                            w2=w((d_model, d_ff)), b2=w((1, d_ff)),
                            w3=w((d_ff, d_model)), b3=w((1, d_model)),
                            gamma=1e-4 * jnp.ones((1, d_model), jnp.float32)))
              for _ in range(num_layers)]

    # Rotary embedding caches (per-head dim dh); emb = cat(freqs, freqs).
    inv_freq = 1.0 / (10000.0 ** (jnp.arange(0, dh, 2, dtype=jnp.float32) / dh))
    t = jnp.arange(max_len, dtype=jnp.float32)
    freqs = t[:, None] * inv_freq[None, :]
    emb = jnp.concatenate([freqs, freqs], axis=-1)            # (max_len, dh)

    return dict(embed=w((vocab_size, d_model)),
                layers=layers,
                norm_w=jnp.ones((1, d_model), jnp.float32),
                out_w=w((d_model, vocab_size)),
                out_b=w((1, vocab_size)),
                rope_cos=jnp.cos(emb),
                rope_sin=jnp.sin(emb))


# ----------------------------- Pure-JAX reference -----------------------------

def _ref_rmsnorm(x, g):
    rms = jnp.sqrt(jnp.mean(x * x, axis=-1, keepdims=True) + EPS)
    return g * (x / rms)


def _ref_rope(x, c, s):
    dh = x.shape[-1]
    x1, x2 = x[..., :dh // 2], x[..., dh // 2:]
    rot = jnp.concatenate([-x2, x1], axis=-1)
    return x * c + rot * s


def _ref_mha(xq, xkv, qw, qb, kw, kb, vw, vb, ow, ob, gamma, cos, sin, num_heads):
    B, Sq, D = xq.shape
    Sk = xkv.shape[1]
    dh = D // num_heads
    q = (xq @ qw + qb).reshape(B, Sq, num_heads, dh).transpose(0, 2, 1, 3)
    k = (xkv @ kw + kb).reshape(B, Sk, num_heads, dh).transpose(0, 2, 1, 3)
    v = (xkv @ vw + vb).reshape(B, Sk, num_heads, dh).transpose(0, 2, 1, 3)
    q = _ref_rope(q, cos[:Sq][None, None], sin[:Sq][None, None])
    k = _ref_rope(k, cos[:Sk][None, None], sin[:Sk][None, None])
    logits = jnp.einsum("bhqd,bhkd->bhqk", q, k) / math.sqrt(dh)
    wts = jax.nn.softmax(logits, axis=-1)
    attn = jnp.einsum("bhqk,bhkd->bhqd", wts, v).transpose(0, 2, 1, 3)
    attn = attn.reshape(B, Sq, D)
    return gamma * (attn @ ow + ob)


def _ref_layer(x, enc, p, cos, sin, num_heads):
    D = x.shape[-1]
    sa = p["self_attn"]
    h = _ref_rmsnorm(x, p["norm1_w"])
    x = x + _ref_mha(h, h,
                     sa["qkv_w"][:, :D], sa["qkv_b"][:, :D],
                     sa["qkv_w"][:, D:2 * D], sa["qkv_b"][:, D:2 * D],
                     sa["qkv_w"][:, 2 * D:], sa["qkv_b"][:, 2 * D:],
                     sa["o_w"], sa["o_b"], sa["gamma"], cos, sin, num_heads)
    ca = p["cross_attn"]
    h = _ref_rmsnorm(x, p["norm2_w"])
    x = x + _ref_mha(h, enc,
                     ca["q_w"], ca["q_b"],
                     ca["kv_w"][:, :D], ca["kv_b"][:, :D],
                     ca["kv_w"][:, D:], ca["kv_b"][:, D:],
                     ca["o_w"], ca["o_b"], ca["gamma"], cos, sin, num_heads)
    fp = p["ffn"]
    h = _ref_rmsnorm(x, p["norm3_w"])
    gated = (h @ fp["w1"] + fp["b1"]) * jax.nn.sigmoid(h @ fp["w2"] + fp["b2"])
    x = x + fp["gamma"] * (gated @ fp["w3"] + fp["b3"])
    return x


def ref_forward(tokens, enc, params, num_heads):
    D = params["embed"].shape[1]
    x = params["embed"][tokens] * math.sqrt(D)
    for lp in params["layers"]:
        x = _ref_layer(x, enc, lp, params["rope_cos"], params["rope_sin"],
                       num_heads)
    x = _ref_rmsnorm(x, params["norm_w"])
    return x @ params["out_w"] + params["out_b"]


# ---------------------------------- main --------------------------------------

if __name__ == "__main__":
    d_model, num_heads, d_ff, num_layers = 32, 4, 64, 2
    vocab_size, max_len = 64, 32
    B, S_tgt, S_src = 2, 8, 8

    key = jax.random.PRNGKey(0)
    pkey, tkey, ekey = jax.random.split(key, 3)

    params = init_params(pkey, d_model, num_heads, d_ff, num_layers,
                         vocab_size, max_len)
    tokens = jax.random.randint(tkey, (B, S_tgt), 0, vocab_size, dtype=jnp.int32)
    enc_output = 0.1 * jax.random.normal(ekey, (B, S_src, d_model),
                                         dtype=jnp.float32)

    out = transformer_decoder(tokens, enc_output, params, num_heads)
    out = jax.block_until_ready(out)
    assert out.shape == (B, S_tgt, vocab_size)

    ref = ref_forward(tokens, enc_output, params, num_heads)
    np.testing.assert_allclose(np.asarray(out), np.asarray(ref),
                               rtol=2e-3, atol=2e-3)
    print("KERNEL_OK")
</pallas_src>

<mosaic_0001>
module attributes {stable_mosaic.version = 11 : i64} {
  func.func @_self_attn_kernel(%arg0: i32, %arg1: memref<8x32xf32, #tpu.memory_space<vmem>>, %arg2: memref<1x32xf32, #tpu.memory_space<vmem>>, %arg3: memref<32x96xf32, #tpu.memory_space<vmem>>, %arg4: memref<1x96xf32, #tpu.memory_space<vmem>>, %arg5: memref<8x4xf32, #tpu.memory_space<vmem>>, %arg6: memref<8x4xf32, #tpu.memory_space<vmem>>, %arg7: memref<32x32xf32, #tpu.memory_space<vmem>>, %arg8: memref<1x32xf32, #tpu.memory_space<vmem>>, %arg9: memref<1x32xf32, #tpu.memory_space<vmem>>, %arg10: memref<8x32xf32, #tpu.memory_space<vmem>>) attributes {dimension_semantics = [#tpu.dimension_semantics<parallel>], iteration_bounds = array<i64: 2>, scalar_prefetch = 0 : i64, scratch_operands = 0 : i64, tpu.core_type = #tpu.core_type<tc>, window_params = [{transform_indices = @transform_0, window_bounds = array<i64: 8, 32>}, {pipeline_mode = #tpu.pipeline_mode<synchronous>, transform_indices = @transform_1, window_bounds = array<i64: 1, 32>}, {pipeline_mode = #tpu.pipeline_mode<synchronous>, transform_indices = @transform_2, window_bounds = array<i64: 32, 96>}, {pipeline_mode = #tpu.pipeline_mode<synchronous>, transform_indices = @transform_3, window_bounds = array<i64: 1, 96>}, {pipeline_mode = #tpu.pipeline_mode<synchronous>, transform_indices = @transform_4, window_bounds = array<i64: 8, 4>}, {pipeline_mode = #tpu.pipeline_mode<synchronous>, transform_indices = @transform_5, window_bounds = array<i64: 8, 4>}, {pipeline_mode = #tpu.pipeline_mode<synchronous>, transform_indices = @transform_6, window_bounds = array<i64: 32, 32>}, {pipeline_mode = #tpu.pipeline_mode<synchronous>, transform_indices = @transform_7, window_bounds = array<i64: 1, 32>}, {pipeline_mode = #tpu.pipeline_mode<synchronous>, transform_indices = @transform_8, window_bounds = array<i64: 1, 32>}, {transform_indices = @transform_9, window_bounds = array<i64: 8, 32>}]} {
    %c0 = arith.constant 0 : index
    %c0_0 = arith.constant 0 : index
    %0 = vector.load %arg1[%c0, %c0_0] : memref<8x32xf32, #tpu.memory_space<vmem>>, vector<8x32xf32>
    %c0_1 = arith.constant 0 : index
    %c0_2 = arith.constant 0 : index
    %1 = vector.load %arg2[%c0_1, %c0_2] : memref<1x32xf32, #tpu.memory_space<vmem>>, vector<1x32xf32>
    %2 = arith.mulf %0, %0 : vector<8x32xf32>
    %cst = arith.constant dense<0.000000e+00> : vector<8xf32>
    %3 = vector.multi_reduction <add>, %2, %cst [1] : vector<8x32xf32> to vector<8xf32>
    %4 = vector.shape_cast %3 : vector<8xf32> to vector<8x1xf32>
    %cst_3 = arith.constant 3.200000e+01 : f32
    %5 = vector.broadcast %cst_3 : f32 to vector<8x1xf32>
    %6 = arith.divf %4, %5 : vector<8x1xf32>
    %cst_4 = arith.constant 9.99999997E-7 : f32
    %7 = vector.broadcast %cst_4 : f32 to vector<8x1xf32>
    %8 = arith.addf %6, %7 : vector<8x1xf32>
    %9 = math.rsqrt %8 : vector<8x1xf32>
    %10 = vector.broadcast %9 : vector<8x1xf32> to vector<8x32xf32>
    %11 = arith.mulf %0, %10 : vector<8x32xf32>
    %12 = vector.broadcast %1 : vector<1x32xf32> to vector<8x32xf32>
    %13 = arith.mulf %12, %11 : vector<8x32xf32>
    %c0_5 = arith.constant 0 : index
    %c0_6 = arith.constant 0 : index
    %14 = vector.load %arg3[%c0_5, %c0_6] : memref<32x96xf32, #tpu.memory_space<vmem>>, vector<32x96xf32>
    %cst_7 = arith.constant dense<0.000000e+00> : vector<8x96xf32>
    %15 = tpu.matmul %13, %14, %cst_7 {dimension_numbers = #tpu.dot_dimension_numbers<[1], [0], [0], [1], [0, 0, 1, 1], [], []>} : vector<8x32xf32>, vector<32x96xf32>, vector<8x96xf32> -> vector<8x96xf32>
    %c0_8 = arith.constant 0 : index
    %c0_9 = arith.constant 0 : index
    %16 = vector.load %arg4[%c0_8, %c0_9] : memref<1x96xf32, #tpu.memory_space<vmem>>, vector<1x96xf32>
    %17 = vector.broadcast %16 : vector<1x96xf32> to vector<8x96xf32>
    %18 = arith.addf %15, %17 : vector<8x96xf32>
    %19 = vector.extract_strided_slice %18 {offsets = [0, 0], sizes = [8, 32], strides = [1, 1]} : vector<8x96xf32> to vector<8x32xf32>
    %20 = vector.extract_strided_slice %18 {offsets = [0, 32], sizes = [8, 32], strides = [1, 1]} : vector<8x96xf32> to vector<8x32xf32>
    %21 = vector.extract_strided_slice %18 {offsets = [0, 64], sizes = [8, 32], strides = [1, 1]} : vector<8x96xf32> to vector<8x32xf32>
    %c0_10 = arith.constant 0 : index
    %c0_11 = arith.constant 0 : index
    %22 = vector.load %arg5[%c0_10, %c0_11] : memref<8x4xf32, #tpu.memory_space<vmem>>, vector<8x4xf32>
    %c0_12 = arith.constant 0 : index
    %c0_13 = arith.constant 0 : index
    %23 = vector.load %arg6[%c0_12, %c0_13] : memref<8x4xf32, #tpu.memory_space<vmem>>, vector<8x4xf32>
    %c0_14 = arith.constant 0 : index
    %c0_15 = arith.constant 0 : index
    %24 = vector.load %arg7[%c0_14, %c0_15] : memref<32x32xf32, #tpu.memory_space<vmem>>, vector<32x32xf32>
    %25 = vector.extract_strided_slice %19 {offsets = [0, 0], sizes = [8, 4], strides = [1, 1]} : vector<8x32xf32> to vector<8x4xf32>
    %cst_16 = arith.constant 0.353553385 : f32
    %26 = vector.broadcast %cst_16 : f32 to vector<8x4xf32>
    %27 = arith.mulf %25, %26 : vector<8x4xf32>
    %28 = vector.extract_strided_slice %19 {offsets = [0, 4], sizes = [8, 4], strides = [1, 1]} : vector<8x32xf32> to vector<8x4xf32>
    %cst_17 = arith.constant 0.353553385 : f32
    %29 = vector.broadcast %cst_17 : f32 to vector<8x4xf32>
    %30 = arith.mulf %28, %29 : vector<8x4xf32>
    %31 = vector.extract_strided_slice %20 {offsets = [0, 0], sizes = [8, 4], strides = [1, 1]} : vector<8x32xf32> to vector<8x4xf32>
    %32 = vector.extract_strided_slice %20 {offsets = [0, 4], sizes = [8, 4], strides = [1, 1]} : vector<8x32xf32> to vector<8x4xf32>
    %33 = arith.mulf %27, %22 : vector<8x4xf32>
    %34 = arith.mulf %30, %23 : vector<8x4xf32>
    %35 = arith.subf %33, %34 : vector<8x4xf32>
    %36 = arith.mulf %30, %22 : vector<8x4xf32>
    %37 = arith.mulf %27, %23 : vector<8x4xf32>
    %38 = arith.addf %36, %37 : vector<8x4xf32>
    %39 = arith.mulf %31, %22 : vector<8x4xf32>
    %40 = arith.mulf %32, %23 : vector<8x4xf32>
    %41 = arith.subf %39, %40 : vector<8x4xf32>
    %42 = arith.mulf %32, %22 : vector<8x4xf32>
    %43 = arith.mulf %31, %23 : vector<8x4xf32>
    %44 = arith.addf %42, %43 : vector<8x4xf32>
    %cst_18 = arith.constant dense<0.000000e+00> : vector<8x8xf32>
    %45 = tpu.matmul %35, %41, %cst_18 {dimension_numbers = #tpu.dot_dimension_numbers<[1], [1], [0], [0], [0, 0, 1, 0], [], []>} : vector<8x4xf32>, vector<8x4xf32>, vector<8x8xf32> -> vector<8x8xf32>
    %cst_19 = arith.constant dense<0.000000e+00> : vector<8x8xf32>
    %46 = tpu.matmul %38, %44, %cst_19 {dimension_numbers = #tpu.dot_dimension_numbers<[1], [1], [0], [0], [0, 0, 1, 0], [], []>} : vector<8x4xf32>, vector<8x4xf32>, vector<8x8xf32> -> vector<8x8xf32>
    %47 = arith.addf %45, %46 : vector<8x8xf32>
    %cst_20 = arith.constant dense<0xFF800000> : vector<8xf32>
    %48 = vector.multi_reduction <maximumf>, %47, %cst_20 [1] : vector<8x8xf32> to vector<8xf32>
    %49 = vector.shape_cast %48 : vector<8xf32> to vector<8x1xf32>
    %50 = vector.broadcast %49 : vector<8x1xf32> to vector<8x8xf32>
    %51 = arith.subf %47, %50 : vector<8x8xf32>
    %52 = math.exp %51 : vector<8x8xf32>
    %cst_21 = arith.constant dense<0.000000e+00> : vector<8xf32>
    %53 = vector.multi_reduction <add>, %52, %cst_21 [1] : vector<8x8xf32> to vector<8xf32>
    %54 = vector.shape_cast %53 : vector<8xf32> to vector<8x1xf32>
    %55 = tpu.reciprocal %54 {approx = true} : vector<8x1xf32> -> vector<8x1xf32>
    %56 = vector.broadcast %55 : vector<8x1xf32> to vector<8x8xf32>
    %57 = arith.mulf %52, %56 : vector<8x8xf32>
    %58 = vector.extract_strided_slice %21 {offsets = [0, 0], sizes = [8, 8], strides = [1, 1]} : vector<8x32xf32> to vector<8x8xf32>
    %cst_22 = arith.constant dense<0.000000e+00> : vector<8x8xf32>
    %59 = tpu.matmul %57, %58, %cst_22 {dimension_numbers = #tpu.dot_dimension_numbers<[1], [0], [0], [1], [0, 0, 1, 1], [], []>} : vector<8x8xf32>, vector<8x8xf32>, vector<8x8xf32> -> vector<8x8xf32>
    %60 = vector.extract_strided_slice %19 {offsets = [0, 8], sizes = [8, 4], strides = [1, 1]} : vector<8x32xf32> to vector<8x4xf32>
    %cst_23 = arith.constant 0.353553385 : f32
    %61 = vector.broadcast %cst_23 : f32 to vector<8x4xf32>
    %62 = arith.mulf %60, %61 : vector<8x4xf32>
    %63 = vector.extract_strided_slice %19 {offsets = [0, 12], sizes = [8, 4], strides = [1, 1]} : vector<8x32xf32> to vector<8x4xf32>
    %cst_24 = arith.constant 0.353553385 : f32
    %64 = vector.broadcast %cst_24 : f32 to vector<8x4xf32>
    %65 = arith.mulf %63, %64 : vector<8x4xf32>
    %66 = vector.extract_strided_slice %20 {offsets = [0, 8], sizes = [8, 4], strides = [1, 1]} : vector<8x32xf32> to vector<8x4xf32>
    %67 = vector.extract_strided_slice %20 {offsets = [0, 12], sizes = [8, 4], strides = [1, 1]} : vector<8x32xf32> to vector<8x4xf32>
    %68 = arith.mulf %62, %22 : vector<8x4xf32>
    %69 = arith.mulf %65, %23 : vector<8x4xf32>
    %70 = arith.subf %68, %69 : vector<8x4xf32>
    %71 = arith.mulf %65, %22 : vector<8x4xf32>
    %72 = arith.mulf %62, %23 : vector<8x4xf32>
    %73 = arith.addf %71, %72 : vector<8x4xf32>
    %74 = arith.mulf %66, %22 : vector<8x4xf32>
    %75 = arith.mulf %67, %23 : vector<8x4xf32>
    %76 = arith.subf %74, %75 : vector<8x4xf32>
    %77 = arith.mulf %67, %22 : vector<8x4xf32>
    %78 = arith.mulf %66, %23 : vector<8x4xf32>
    %79 = arith.addf %77, %78 : vector<8x4xf32>
    %cst_25 = arith.constant dense<0.000000e+00> : vector<8x8xf32>
    %80 = tpu.matmul %70, %76, %cst_25 {dimension_numbers = #tpu.dot_dimension_numbers<[1], [1], [0], [0], [0, 0, 1, 0], [], []>} : vector<8x4xf32>, vector<8x4xf32>, vector<8x8xf32> -> vector<8x8xf32>
    %cst_26 = arith.constant dense<0.000000e+00> : vector<8x8xf32>
    %81 = tpu.matmul %73, %79, %cst_26 {dimension_numbers = #tpu.dot_dimension_numbers<[1], [1], [0], [0], [0, 0, 1, 0], [], []>} : vector<8x4xf32>, vector<8x4xf32>, vector<8x8xf32> -> vector<8x8xf32>
    %82 = arith.addf %80, %81 : vector<8x8xf32>
    %cst_27 = arith.constant dense<0xFF800000> : vector<8xf32>
    %83 = vector.multi_reduction <maximumf>, %82, %cst_27 [1] : vector<8x8xf32> to vector<8xf32>
    %84 = vector.shape_cast %83 : vector<8xf32> to vector<8x1xf32>
    %85 = vector.broadcast %84 : vector<8x1xf32> to vector<8x8xf32>
    %86 = arith.subf %82, %85 : vector<8x8xf32>
    %87 = math.exp %86 : vector<8x8xf32>
    %cst_28 = arith.constant dense<0.000000e+00> : vector<8xf32>
    %88 = vector.multi_reduction <add>, %87, %cst_28 [1] : vector<8x8xf32> to vector<8xf32>
    %89 = vector.shape_cast %88 : vector<8xf32> to vector<8x1xf32>
    %90 = tpu.reciprocal %89 {approx = true} : vector<8x1xf32> -> vector<8x1xf32>
    %91 = vector.broadcast %90 : vector<8x1xf32> to vector<8x8xf32>
    %92 = arith.mulf %87, %91 : vector<8x8xf32>
    %93 = vector.extract_strided_slice %21 {offsets = [0, 8], sizes = [8, 8], strides = [1, 1]} : vector<8x32xf32> to vector<8x8xf32>
    %cst_29 = arith.constant dense<0.000000e+00> : vector<8x8xf32>
    %94 = tpu.matmul %92, %93, %cst_29 {dimension_numbers = #tpu.dot_dimension_numbers<[1], [0], [0], [1], [0, 0, 1, 1], [], []>} : vector<8x8xf32>, vector<8x8xf32>, vector<8x8xf32> -> vector<8x8xf32>
    %95 = vector.extract_strided_slice %19 {offsets = [0, 16], sizes = [8, 4], strides = [1, 1]} : vector<8x32xf32> to vector<8x4xf32>
    %cst_30 = arith.constant 0.353553385 : f32
    %96 = vector.broadcast %cst_30 : f32 to vector<8x4xf32>
    %97 = arith.mulf %95, %96 : vector<8x4xf32>
    %98 = vector.extract_strided_slice %19 {offsets = [0, 20], sizes = [8, 4], strides = [1, 1]} : vector<8x32xf32> to vector<8x4xf32>
    %cst_31 = arith.constant 0.353553385 : f32
    %99 = vector.broadcast %cst_31 : f32 to vector<8x4xf32>
    %100 = arith.mulf %98, %99 : vector<8x4xf32>
    %101 = vector.extract_strided_slice %20 {offsets = [0, 16], sizes = [8, 4], strides = [1, 1]} : vector<8x32xf32> to vector<8x4xf32>
    %102 = vector.extract_strided_slice %20 {offsets = [0, 20], sizes = [8, 4], strides = [1, 1]} : vector<8x32xf32> to vector<8x4xf32>
    %103 = arith.mulf %97, %22 : vector<8x4xf32>
    %104 = arith.mulf %100, %23 : vector<8x4xf32>
    %105 = arith.subf %103, %104 : vector<8x4xf32>
    %106 = arith.mulf %100, %22 : vector<8x4xf32>
    %107 = arith.mulf %97, %23 : vector<8x4xf32>
    %108 = arith.addf %106, %107 : vector<8x4xf32>
    %109 = arith.mulf %101, %22 : vector<8x4xf32>
    %110 = arith.mulf %102, %23 : vector<8x4xf32>
    %111 = arith.subf %109, %110 : vector<8x4xf32>
    %112 = arith.mulf %102, %22 : vector<8x4xf32>
    %113 = arith.mulf %101, %23 : vector<8x4xf32>
    %114 = arith.addf %112, %113 : vector<8x4xf32>
    %cst_32 = arith.constant dense<0.000000e+00> : vector<8x8xf32>
    %115 = tpu.matmul %105, %111, %cst_32 {dimension_numbers = #tpu.dot_dimension_numbers<[1], [1], [0], [0], [0, 0, 1, 0], [], []>} : vector<8x4xf32>, vector<8x4xf32>, vector<8x8xf32> -> vector<8x8xf32>
    %cst_33 = arith.constant dense<0.000000e+00> : vector<8x8xf32>
    %116 = tpu.matmul %108, %114, %cst_33 {dimension_numbers = #tpu.dot_dimension_numbers<[1], [1], [0], [0], [0, 0, 1, 0], [], []>} : vector<8x4xf32>, vector<8x4xf32>, vector<8x8xf32> -> vector<8x8xf32>
    %117 = arith.addf %115, %116 : vector<8x8xf32>
    %cst_34 = arith.constant dense<0xFF800000> : vector<8xf32>
    %118 = vector.multi_reduction <maximumf>, %117, %cst_34 [1] : vector<8x8xf32> to vector<8xf32>
    %119 = vector.shape_cast %118 : vector<8xf32> to vector<8x1xf32>
    %120 = vector.broadcast %119 : vector<8x1xf32> to vector<8x8xf32>
    %121 = arith.subf %117, %120 : vector<8x8xf32>
    %122 = math.exp %121 : vector<8x8xf32>
    %cst_35 = arith.constant dense<0.000000e+00> : vector<8xf32>
    %123 = vector.multi_reduction <add>, %122, %cst_35 [1] : vector<8x8xf32> to vector<8xf32>
    %124 = vector.shape_cast %123 : vector<8xf32> to vector<8x1xf32>
    %125 = tpu.reciprocal %124 {approx = true} : vector<8x1xf32> -> vector<8x1xf32>
    %126 = vector.broadcast %125 : vector<8x1xf32> to vector<8x8xf32>
    %127 = arith.mulf %122, %126 : vector<8x8xf32>
    %128 = vector.extract_strided_slice %21 {offsets = [0, 16], sizes = [8, 8], strides = [1, 1]} : vector<8x32xf32> to vector<8x8xf32>
    %cst_36 = arith.constant dense<0.000000e+00> : vector<8x8xf32>
    %129 = tpu.matmul %127, %128, %cst_36 {dimension_numbers = #tpu.dot_dimension_numbers<[1], [0], [0], [1], [0, 0, 1, 1], [], []>} : vector<8x8xf32>, vector<8x8xf32>, vector<8x8xf32> -> vector<8x8xf32>
    %130 = vector.extract_strided_slice %19 {offsets = [0, 24], sizes = [8, 4], strides = [1, 1]} : vector<8x32xf32> to vector<8x4xf32>
    %cst_37 = arith.constant 0.353553385 : f32
    %131 = vector.broadcast %cst_37 : f32 to vector<8x4xf32>
    %132 = arith.mulf %130, %131 : vector<8x4xf32>
    %133 = vector.extract_strided_slice %19 {offsets = [0, 28], sizes = [8, 4], strides = [1, 1]} : vector<8x32xf32> to vector<8x4xf32>
    %cst_38 = arith.constant 0.353553385 : f32
    %134 = vector.broadcast %cst_38 : f32 to vector<8x4xf32>
    %135 = arith.mulf %133, %134 : vector<8x4xf32>
    %136 = vector.extract_strided_slice %20 {offsets = [0, 24], sizes = [8, 4], strides = [1, 1]} : vector<8x32xf32> to vector<8x4xf32>
    %137 = vector.extract_strided_slice %20 {offsets = [0, 28], sizes = [8, 4], strides = [1, 1]} : vector<8x32xf32> to vector<8x4xf32>
    %138 = arith.mulf %132, %22 : vector<8x4xf32>
    %139 = arith.mulf %135, %23 : vector<8x4xf32>
    %140 = arith.subf %138, %139 : vector<8x4xf32>
    %141 = arith.mulf %135, %22 : vector<8x4xf32>
    %142 = arith.mulf %132, %23 : vector<8x4xf32>
    %143 = arith.addf %141, %142 : vector<8x4xf32>
    %144 = arith.mulf %136, %22 : vector<8x4xf32>
    %145 = arith.mulf %137, %23 : vector<8x4xf32>
    %146 = arith.subf %144, %145 : vector<8x4xf32>
    %147 = arith.mulf %137, %22 : vector<8x4xf32>
    %148 = arith.mulf %136, %23 : vector<8x4xf32>
    %149 = arith.addf %147, %148 : vector<8x4xf32>
    %cst_39 = arith.constant dense<0.000000e+00> : vector<8x8xf32>
    %150 = tpu.matmul %140, %146, %cst_39 {dimension_numbers = #tpu.dot_dimension_numbers<[1], [1], [0], [0], [0, 0, 1, 0], [], []>} : vector<8x4xf32>, vector<8x4xf32>, vector<8x8xf32> -> vector<8x8xf32>
    %cst_40 = arith.constant dense<0.000000e+00> : vector<8x8xf32>
    %151 = tpu.matmul %143, %149, %cst_40 {dimension_numbers = #tpu.dot_dimension_numbers<[1], [1], [0], [0], [0, 0, 1, 0], [], []>} : vector<8x4xf32>, vector<8x4xf32>, vector<8x8xf32> -> vector<8x8xf32>
    %152 = arith.addf %150, %151 : vector<8x8xf32>
    %cst_41 = arith.constant dense<0xFF800000> : vector<8xf32>
    %153 = vector.multi_reduction <maximumf>, %152, %cst_41 [1] : vector<8x8xf32> to vector<8xf32>
    %154 = vector.shape_cast %153 : vector<8xf32> to vector<8x1xf32>
    %155 = vector.broadcast %154 : vector<8x1xf32> to vector<8x8xf32>
    %156 = arith.subf %152, %155 : vector<8x8xf32>
    %157 = math.exp %156 : vector<8x8xf32>
    %cst_42 = arith.constant dense<0.000000e+00> : vector<8xf32>
    %158 = vector.multi_reduction <add>, %157, %cst_42 [1] : vector<8x8xf32> to vector<8xf32>
    %159 = vector.shape_cast %158 : vector<8xf32> to vector<8x1xf32>
    %160 = tpu.reciprocal %159 {approx = true} : vector<8x1xf32> -> vector<8x1xf32>
    %161 = vector.broadcast %160 : vector<8x1xf32> to vector<8x8xf32>
    %162 = arith.mulf %157, %161 : vector<8x8xf32>
    %163 = vector.extract_strided_slice %21 {offsets = [0, 24], sizes = [8, 8], strides = [1, 1]} : vector<8x32xf32> to vector<8x8xf32>
    %cst_43 = arith.constant dense<0.000000e+00> : vector<8x8xf32>
    %164 = tpu.matmul %162, %163, %cst_43 {dimension_numbers = #tpu.dot_dimension_numbers<[1], [0], [0], [1], [0, 0, 1, 1], [], []>} : vector<8x8xf32>, vector<8x8xf32>, vector<8x8xf32> -> vector<8x8xf32>
    %165 = tpu.concatenate %59, %94, %129, %164 in 1 : vector<8x8xf32>, vector<8x8xf32>, vector<8x8xf32>, vector<8x8xf32> -> vector<8x32xf32>
    %cst_44 = arith.constant dense<0.000000e+00> : vector<8x32xf32>
    %166 = tpu.matmul %165, %24, %cst_44 {dimension_numbers = #tpu.dot_dimension_numbers<[1], [0], [0], [1], [0, 0, 1, 1], [], []>} : vector<8x32xf32>, vector<32x32xf32>, vector<8x32xf32> -> vector<8x32xf32>
    %c0_45 = arith.constant 0 : index
    %c0_46 = arith.constant 0 : index
    %167 = vector.load %arg9[%c0_45, %c0_46] : memref<1x32xf32, #tpu.memory_space<vmem>>, vector<1x32xf32>
    %c0_47 = arith.constant 0 : index
    %c0_48 = arith.constant 0 : index
    %168 = vector.load %arg8[%c0_47, %c0_48] : memref<1x32xf32, #tpu.memory_space<vmem>>, vector<1x32xf32>
    %169 = vector.broadcast %168 : vector<1x32xf32> to vector<8x32xf32>
    %170 = arith.addf %166, %169 : vector<8x32xf32>
    %171 = vector.broadcast %167 : vector<1x32xf32> to vector<8x32xf32>
    %172 = arith.mulf %171, %170 : vector<8x32xf32>
    %173 = arith.addf %0, %172 : vector<8x32xf32>
    %c0_49 = arith.constant 0 : index
    %c0_50 = arith.constant 0 : index
    %174 = vector.load %arg10[%c0_49, %c0_50] : memref<8x32xf32, #tpu.memory_space<vmem>>, vector<8x32xf32>
    tpu.vector_store %arg10[%c0_49, %c0_50], %173 {strides = array<i32>} : memref<8x32xf32, #tpu.memory_space<vmem>>, vector<8x32xf32>,
    return
  }
  func.func @transform_0(%arg0: i32) -> (i32, i32) {
    %c0_i32 = arith.constant 0 : i32
    %c0_i32_0 = arith.constant 0 : i32
    return %arg0, %c0_i32 : i32, i32
  }
  func.func @transform_1(%arg0: i32) -> (i32, i32) {
    %c0_i32 = arith.constant 0 : i32
    %c0_i32_0 = arith.constant 0 : i32
    %c0_i32_1 = arith.constant 0 : i32
    return %c0_i32, %c0_i32_0 : i32, i32
  }
  func.func @transform_2(%arg0: i32) -> (i32, i32) {
    %c0_i32 = arith.constant 0 : i32
    %c0_i32_0 = arith.constant 0 : i32
    %c0_i32_1 = arith.constant 0 : i32
    return %c0_i32, %c0_i32_0 : i32, i32
  }
  func.func @transform_3(%arg0: i32) -> (i32, i32) {
    %c0_i32 = arith.constant 0 : i32
    %c0_i32_0 = arith.constant 0 : i32
    %c0_i32_1 = arith.constant 0 : i32
    return %c0_i32, %c0_i32_0 : i32, i32
  }
  func.func @transform_4(%arg0: i32) -> (i32, i32) {
    %c0_i32 = arith.constant 0 : i32
    %c0_i32_0 = arith.constant 0 : i32
    %c0_i32_1 = arith.constant 0 : i32
    return %c0_i32, %c0_i32_0 : i32, i32
  }
  func.func @transform_5(%arg0: i32) -> (i32, i32) {
    %c0_i32 = arith.constant 0 : i32
    %c0_i32_0 = arith.constant 0 : i32
    %c0_i32_1 = arith.constant 0 : i32
    return %c0_i32, %c0_i32_0 : i32, i32
  }
  func.func @transform_6(%arg0: i32) -> (i32, i32) {
    %c0_i32 = arith.constant 0 : i32
    %c0_i32_0 = arith.constant 0 : i32
    %c0_i32_1 = arith.constant 0 : i32
    return %c0_i32, %c0_i32_0 : i32, i32
  }
  func.func @transform_7(%arg0: i32) -> (i32, i32) {
    %c0_i32 = arith.constant 0 : i32
    %c0_i32_0 = arith.constant 0 : i32
    %c0_i32_1 = arith.constant 0 : i32
    return %c0_i32, %c0_i32_0 : i32, i32
  }
  func.func @transform_8(%arg0: i32) -> (i32, i32) {
    %c0_i32 = arith.constant 0 : i32
    %c0_i32_0 = arith.constant 0 : i32
    %c0_i32_1 = arith.constant 0 : i32
    return %c0_i32, %c0_i32_0 : i32, i32
  }
  func.func @transform_9(%arg0: i32) -> (i32, i32) {
    %c0_i32 = arith.constant 0 : i32
    %c0_i32_0 = arith.constant 0 : i32
    return %arg0, %c0_i32 : i32, i32
  }
}

</mosaic_0001>

<bundles_post_ra>
// kernel: tpu_custom_call.1
= control target key start
LH: loop header
LB: loop body
LE: loop exit
PB: predicated region body
PF: predicated region fallthrough
CT: control target
= control target key end

     0   :  { %s2740_s0 = inlined_call_operand.hbm [shape: f32[16,32], index: 0, kind: input, shape index: {}]   ;;  %s2741_s1 = inlined_call_operand.vmem [shape: f32[1,32], index: 1, kind: input, shape index: {}]   ;;  %s2742_s2 = inlined_call_operand.hbm [shape: f32[32,96], index: 2, kind: input, shape index: {}]   ;;  %s2743_s3 = inlined_call_operand.vmem [shape: f32[1,96], index: 3, kind: input, shape index: {}]   ;;  %s2744_s4 = inlined_call_operand.vmem [shape: f32[8,4], index: 4, kind: input, shape index: {}]   ;;  %s2745_s5 = inlined_call_operand.vmem [shape: f32[8,4], index: 5, kind: input, shape index: {}]   ;;  %s2746_s6 = inlined_call_operand.vmem [shape: f32[32,32], index: 6, kind: input, shape index: {}]   ;;  %s2747_s7 = inlined_call_operand.vmem [shape: f32[1,32], index: 7, kind: input, shape index: {}]   ;;  %s2748_s8 = inlined_call_operand.vmem [shape: f32[1,32], index: 8, kind: input, shape index: {}]   ;;  %s2749_s9 = inlined_call_operand.hbm [shape: f32[16,32], index: 9, kind: output, shape index: {}]  }
   0x1   :  { %2757 = sst [smem:[#allocation14_spill]] %s2742_s2 }
   0x2   :  { %14 = vsyncpa [#allocation3], 0 }
   0x3   :  { %16 = vsyncpa [#allocation3 + $0x1], 0 }
   0x4   :  { %17 = vsyncpa [#allocation6], 0 }
   0x5   :  { %18 = vsyncpa [#allocation4], 0 }
   0x6   :  { %20 = vsyncpa [#allocation4 + $0x1], 0  ;;  %s2345_s30 = smov 0   ;;  %s2347_s10 = smov 0  }
   0x7   :  { %s2349_s11 = smov 0   ;;  %s2351_s12 = smov 0  }
   0x8 LB: > { %s2366_s13 = sadd.s32 4294967295, %s2255_s12   ;;  %s1867_s14 = sadd.s32 4294967294, %s2255_s12   ;;  %s2255_s12 = sphi %s2351_s12, %s2777_s12   ;;  %s2251_s11 = sphi %s2349_s11, %s2781_s11   ;;  %s2247_s10 = sphi %s2347_s10, %s2780_s10   ;;  %s2243_s30 = sphi %s2345_s30, %s2779_s30  }
   0x9   : > { %p46_p0 = scmp.ne.s32.totalorder %s2247_s10, %s2243_s30  ;;  %p2753_p1 = scmp.eq.s32.totalorder %s2366_s13, 0 }
   0xa   : > { %p244_p3 = scmp.eq.s32.totalorder %s1867_s14, 1  ;;  %p1868_p5 = scmp.ge.s32.totalorder %s2255_s12, 1 }
   0xb   : > { %p2375_p4 = por %p2753_p1, %p46_p0  ;;  %p251_p7 = scmp.lt.s32.totalorder %s2255_s12, 3 }
   0xc   : > { %p2380_p6 = por %p244_p3, %p46_p0  ;;  %s2257_s18 = smov [#allocation5]  }
   0xd   : > { %s2758_s15 = scalar_select %p2375_p4, 1, 0 }
   0xe   : > { %s2759_s16 = scalar_select %p2380_p6, 1, 0 }
   0xf   : > { %p2385_p8 = pnand %p1868_p5, %p251_p7  ;;  %s266_s19 = sshll.u32 %s2257_s18, 4  ;;  %s267_s19 = int_to_ptr.vmem [resolvable:$true] %s266_s19 }
  0x10   : > { %2760 = sst [smem:[#allocation11_spill]] %s2759_s16  ;;  %s2399_s21 = sadd.s32 1, %s2255_s12  }
  0x11   : > { %s2761_s17 = scalar_select %p2385_p8, 1, 0 }
  0x12   : > { %p2031_p9 = pneg %p2385_p8  ;;  %2763 = sst [smem:[#allocation12_spill]] %s2399_s21 }
  0x13   : > { %s33_s22 = sadd.s32 1, %s2251_s11  ;;  %s30_s23 = ssub.s32 %s2255_s12, %s2399_s21 }
  0x14   : > { %p2394_p11 = pnand %p2031_p9, %p2753_p1  ;;  %s2144_s24 = scalar_lea.vmem %s267_s19, 512 }
  0x15   : > { %p2145_p13 = scmp.ne.s32.totalorder %s267_s19, %s2144_s24  ;;  %p2152_p5 = scmp.lt.s32.totalorder %s267_s19, %s267_s19 }
  0x16   : > { %p2135_p12 = pneg %p2394_p11  ;;  %p2153_p7 = scmp.lt.s32.totalorder %s2144_s24, %s2144_s24 }
  0x18   : > { %p2147_p0 = pnand %p2145_p13, %p2135_p12  ;;  %p2154_p10 = por %p2153_p7, %p2152_p5 }
  0x1a   : > { %p2148_p3 = pneg %p2147_p0 }
  0x1c   : > { %p2155_p2 = pnand %p2154_p10, %p2148_p3 }
  0x1e   : > { %2158 = shalt.err (!%p2155_p2)
}
  0x1f   : > { %s2258_s25 = smov 128   ;;  %s2259_s26 = smov 8  }
  0x20   : > { %s2764_s2 = sld [smem:[#allocation14_spill]]  ;;  %p31_p9 = scmp.eq.s32.totalorder %s30_s23, 0 }
  0x21   : > { %p40_p12 = scmp.ne.s32.totalorder %s2251_s11, %s2247_s10  ;;  %p41_p10 = scmp.eq.s32.totalorder %s2255_s12, 0 }
  0x22   : > { %p2044_p2 = scmp.lt.s32.totalorder %s2255_s12, 2  ;;  %p2766_p0 = scmp.eq.s32.totalorder %s2366_s13, 1 }
  0x23   : > { %s2416_s29 = scalar_select %p31_p9, %s2251_s11, %s33_s22  }
  0x24   : > { %p42_p13 = por %p41_p10, %p40_p12  ;;  %p2420_p3 = por %p2766_p0, %p40_p12 }
  0x25   : > { %2765 = sst [smem:[#allocation13_spill]] %s2416_s29  ;;  %s298_s18 = sand.u32 1, %s2251_s11  }
  0x26   : > { %2034 = dma.hbm_to_vmem [thread:$0]  (!%p2394_p11), %s2764_s2, 512, %s267_s19, [#allocation6], %s2258_s25, %s2258_s25, %s2259_s26  }
  0x27   : > { %s2767_s14 = scalar_select %p2420_p3, 1, 0 }
  0x28   : > { %s1872_s24 = sshll.u32 %s2255_s12, 7  ;;  %s1871_s21 = sshll.u32 %s298_s18, 3 }
  0x29   : > { %s2429_s27 = scalar_lea.hbm %s2740_s0, %s1872_s24  ;;  %s302_s19 = scalar_lea.vmem [#allocation2], %s1871_s21 }
  0x2a   : > { %s309_s22 = sshll.u32 %s302_s19, 4  ;;  %p2431_p11 = pnand %p2044_p2, %p42_p13  ;;  %s310_s22 = int_to_ptr.vmem [resolvable:$true] %s309_s22 }
  0x2b   : > { %s299_s25 = scalar_lea.sflag [#allocation3], %s298_s18  ;;  %s2159_s26 = scalar_lea.hbm %s2429_s27, 128 }
  0x2c   : > { %p2160_p5 = scmp.ne.s32.totalorder %s2429_s27, %s2159_s26  ;;  %p2161_p7 = pneg %p2431_p11 }
  0x2d   : > { %s2164_s24 = scalar_lea.hbm %s2740_s0, 256  ;;  %p2165_p10 = scmp.lt.s32.totalorder %s2429_s27, %s2740_s0 }
  0x2e   : > { %p2162_p9 = pnand %p2161_p7, %p2160_p5  ;;  %p2166_p2 = scmp.lt.s32.totalorder %s2164_s24, %s2159_s26 }
  0x30   : > { %p2163_p12 = pneg %p2162_p9  ;;  %p2167_p13 = por %p2166_p2, %p2165_p10 }
  0x32   : > { %p2168_p0 = pnand %p2167_p13, %p2163_p12 }
  0x34   : > { %2171 = shalt.err (!%p2168_p0)
}
  0x35   : > { %s2172_s19 = scalar_lea.vmem %s310_s22, 128  ;;  %s2260_s18 = smov [#allocation2]  }
  0x36   : > { %p2173_p1 = scmp.ne.s32.totalorder %s310_s22, %s2172_s19  ;;  %s2177_s2 = sshll.u32 %s2260_s18, 4  ;;  %s2178_s2 = int_to_ptr.vmem [resolvable:$false] %s2177_s2 }
  0x37   : > { %s2179_s29 = scalar_lea.vmem %s2178_s2, 256  ;;  %p2180_p5 = scmp.lt.s32.totalorder %s310_s22, %s2178_s2 }
  0x38   : > { %p2175_p6 = pnand %p2173_p1, %p2161_p7  ;;  %p2181_p9 = scmp.lt.s32.totalorder %s2179_s29, %s2172_s19 }
  0x3a   : > { %p2176_p3 = pneg %p2175_p6  ;;  %p2182_p4 = por %p2181_p9, %p2180_p5 }
  0x3c   : > { %p2183_p8 = pnand %p2182_p4, %p2176_p3 }
  0x3e   : > { %2186 = shalt.err (!%p2183_p8)
}
  0x3f   : > { %2038 = dma.hbm_to_vmem [thread:$0]  (!%p2431_p11), %s2429_s27, 128, %s310_s22, %s299_s25  }
  0x40   : > { %p2769_p12 = scmp.ne.s32.totalorder %s2761_s17, 0 }
  0x41   : > { %s2452_s26 = sand.u32 (!%p2769_p12), 1, %s2247_s10   ;;  %p2770_p1 = scmp.ne.s32.totalorder (!%p2769_p12), %s2758_s15, 0 }
  0x42   : > { %318 = sbr.rel (%p2769_p12) target bundleno = 3305 (0xce9), region = 56  ;;  %s1874_s16 = sshll.u32 (!%p2769_p12), %s2452_s26, 3 }
  0x43   : > { %s321_s2 = scalar_lea.sflag (!%p2769_p12), [#allocation3], %s2452_s26  ;;  %s324_s29 = scalar_lea.vmem (!%p2769_p12), [#allocation2], %s1874_s16 }
  0x47   : > { %2230 = dma.done.wait (%p2770_p1), %s321_s2, 128  }
  0x48   : > { %2232 = vsyncadd (%p2770_p1), %s321_s2, 4294967168  ;;  %p2771_p4 = scmp.eq.s32.totalorder %s2366_s13, 0 }
  0x4a   : > { %2234 = dma.done.wait (%p2771_p4), [#allocation6], 512   ;;  %p2772_p6 = pmov %p2771_p4 }
  0x4b   : > { %v2466_v0 = vld [vmem:[%s324_s29] sm:$0xff]  ;;  %vm366_vm0 = vcmask 261120   ;;  %v2261_v4 = vmov 0.0   ;;  %vm2262_vm1 = vmmov 0   ;;  %v383_v6 = vld [vmem:[#allocation5 + $0x8] sm:$0xff]  ;;  %v382_v7 = vld [vmem:[#allocation5] sm:$0xff] }
  0x4c   : > { %2236 = vsyncadd (%p2772_p6), [#allocation6], 4294966784  ;;  %v365_v1 = vmul.f32 %v2466_v0, %v2466_v0  ;;  %v385_v3 = vld [vmem:[#allocation5 + $0x18] sm:$0xff]  ;;  %1941 = vmatprep.subr.mxu0 %v2261_v4  ;;  %v384_v5 = vld [vmem:[#allocation5 + $0x10] sm:$0xff]  ;;  %1949 = vmatprep.mubr.msk.f32.mxu0 %vm2262_vm1, %v2261_v4  ;;  %s2263_s27 = smov 36   ;;  %s2264_s25 = smov 32  }
  0x4d   : > { %1942 = vmatpush3.msra.mxu0 %v385_v3  ;;  %1952 = vmatprep.subr.mxu1 %v2261_v4  ;;  %v2484_v8 = vld [vmem:[%s2745_s5] sm:$0xff]  ;;  %s2265_s28 = smov 4   ;;  %s2266_s18 = smov 124   ;;  %vm527_vm2 = vcmask 31744   ;;  %vm680_vm3 = vcmask 64512   ;;  %vm1679_vm4 = vcmask 130048  }
  0x4e   : > { %v367_v2 = vsel %vm366_vm0, %v365_v1, 0.0  ;;  %1943 = vmatprep.subr.mxu0 %v2261_v4  ;;  %1954 = vmatprep.mubr.msk.f32.mxu1 %vm2262_vm1, %v2261_v4  ;;  %v2490_v9 = vld [vmem:[%s2744_s4] sm:$0xff]  ;;  %s2267_s2 = smov 92   ;;  %s2268_s29 = smov 96   ;;  %vm1681_vm5 = vcmask 195584  }
  0x4f   : > { %368 = vadd.xlane.f32.xlu0 %v367_v2  ;;  %1944 = vmatpush3.msra.mxu0 %v384_v5  ;;  %v1877_v14 = vld [vmem:[%s2741_s1] ss:$0 sm:$0xff]  ;;  %s2269_s15 = smov 44   ;;  %s2270_s17 = smov 40  }
  0x50   : > { %1945 = vmatprep.subr.mxu0 %v2261_v4  ;;  %499 = vrot.lane.b32.xlu1 %v2484_v8, %s2263_s27  ;;  %v1878_v17 = vld [vmem:[%s2743_s3] ss:$0 sm:$0xff]  ;;  %s2272_s22 = smov 8   ;;  %s2273_s23 = smov 64  }
  0x51   : > { %1946 = vmatpush3.msra.mxu0 %v383_v6  ;;  %s2275_s24 = smov 88   ;;  %s2276_s20 = smov 116  }
  0x52   : > { %1947 = vmatprep.subr.mxu0 %v2261_v4  ;;  %s2277_s21 = smov 52   ;;  %s2278_s19 = smov 48  }
  0x53   : > { %1948 = vmatpush3.msra.mxu0 %v382_v7  ;;  %p2773_p3 = scmp.ne.s32.totalorder %s2767_s14, 0 }
  0x54   : > { %1972 = vmatprep.subr.mxu0 %v2261_v4  ;;  %508 = vrot.lane.b32.xlu1 %v2490_v9, %s2263_s27  ;;  %s2271_s27 = smov 12  }
  0x58   : > { %485 = vrot.lane.b32.xlu1 %v2490_v9, %s2265_s28 }
  0x5c   : > { %495 = vrot.lane.b32.xlu1 %v2490_v9, %s2264_s25 }
  0x65   : > { %512 = vrot.lane.b32.xlu0 %v2484_v8, %s2264_s25  ;;  %s2274_s25 = smov 84  }
  0x69   : > { %475 = vrot.lane.b32.xlu0 %v2484_v8, %s2265_s28 }
  0xc2   : > { %v500_v25 = vpop.permute.xlu1 %499 }
  0xc6   : > { %v509_v27 = vpop.permute.xlu1 %508 }
  0xca   : > { %v486_v28 = vpop.permute.xlu1 %485 }
  0xce   : > { %v496_v29 = vpop.permute.xlu1 %495 }
  0xd8   : > { %v369_v10 = vpop.xlane.xlu0 %368 }
  0xd9   : > { %v371_v11 = vmul.f32 0.03125, %v369_v10 }
  0xdb   : > { %v372_v12 = vadd.f32 1e-06, %v371_v11 }
  0xdc   : > { %v513_v20 = vpop.permute.xlu0 %512 }
  0xdd   : > { %2115 = vrsqrt.f32 %v372_v12 }
  0xe0   : > { %v476_v36 = vpop.permute.xlu0 %475 }
  0xea   : > { %v2116_v13 = vpop.eup %2115 }
  0xeb   : > { %v374_v15 = vmul.f32 %v2116_v13, %v2466_v0 }
  0xed   : > { %v381_v16 = vmul.f32 %v1877_v14, %v374_v15 }
  0xef   : > { %1950 = vmatmul.mubr.msk.f32.vlgmr.msra.gmra.mxu0 %vm366_vm0, %v381_v16 }
  0xf0   : > { %1974 = vmatprep.mubr.msk.f32.mxu0 %vm2262_vm1, %v2261_v4 }
 0x1af   : > { %v462_v18 = vpop.f32.mrf.mxu0 }
 0x1b0   : > { %v2509_v19 = vadd.f32 %v1878_v17, %v462_v18 }
 0x1b1   : > { %v1951_v21 = vpop.f32.mrf.mxu0 }
 0x1b2   : > { %v515_v22 = vmul.f32 %v513_v20, %v2509_v19  ;;  %v2513_v23 = vmul.f32 0.35355338, %v2509_v19  ;;  %v502_v26 = vmul.f32 %v500_v25, %v2509_v19  ;;  %v511_v30 = vmul.f32 %v509_v27, %v2509_v19 }
 0x1b3   : > { %v498_v37 = vmul.f32 %v496_v29, %v2509_v19 }
 0x1b4   : > { %517 = vrot.lane.b32.xlu1 %v515_v22, %s2265_s28  ;;  %v489_v24 = vmul.f32 %v2513_v23, %v2484_v8  ;;  %v488_v33 = vmul.f32 %v486_v28, %v2513_v23  ;;  %v478_v39 = vmul.f32 %v476_v36, %v2513_v23  ;;  %v473_v43 = vmul.f32 %v2513_v23, %v2490_v9 }
 0x1b8   : > { %491 = vrot.lane.b32.xlu1 %v489_v24, %s2265_s28 }
 0x1bc   : > { %504 = vrot.lane.b32.xlu1 %v502_v26, %s2266_s18 }
 0x226   : > { %v518_v31 = vpop.permute.xlu1 %517 }
 0x227   : > { %v520_v32 = vadd.f32 %v518_v31, %v511_v30 }
 0x229   : > { %525 = vrot.lane.b32.xlu1 %v520_v32, %s2267_s2  ;;  %s2279_s2 = smov 120  }
 0x22a   : > { %v492_v34 = vpop.permute.xlu1 %491 }
 0x22b   : > { %v494_v35 = vadd.f32 %v492_v34, %v488_v33 }
 0x22d   : > { %522 = vrot.lane.b32.xlu0 %v494_v35, %s2266_s18 }
 0x22e   : > { %v505_v38 = vpop.permute.xlu1 %504 }
 0x22f   : > { %v507_v40 = vsub.f32 %v498_v37, %v505_v38 }
 0x231   : > { %603 = vrot.lane.b32.xlu1 %v507_v40, %s2268_s29  ;;  %480 = vrot.lane.b32.xlu0 %v478_v39, %s2266_s18  ;;  %s2280_s29 = smov 20  }
 0x235   : > { %799 = vrot.lane.b32.xlu1 %v2484_v8, %s2269_s15  ;;  %812 = vrot.lane.b32.xlu0 %v2484_v8, %s2270_s17 }
 0x239   : > { %773 = vrot.lane.b32.xlu0 %v2484_v8, %s2271_s27 }
 0x23d   : > { %786 = vrot.lane.b32.xlu0 %v2484_v8, %s2272_s22 }
 0x241   : > { %795 = vrot.lane.b32.xlu0 %v2490_v9, %s2270_s17 }
 0x245   : > { %808 = vrot.lane.b32.xlu0 %v2490_v9, %s2269_s15  ;;  %s2281_s15 = smov 16  }
 0x29b   : > { %v526_v41 = vpop.permute.xlu1 %525 }
 0x29c   : > { %1953 = vmatpush3.xpose.msk.msra.mxu1 %vm527_vm2, %v526_v41 }
 0x29d   : > { %1957 = vmatprep.subr.mxu1 %v2261_v4 }
 0x29f   : > { %v523_v42 = vpop.permute.xlu0 %522 }
 0x2a0   : > { %1955 = vmatmul.mubr.msk.f32.vlgmr.msra.gmra.mxu1 %vm527_vm2, %v523_v42 }
 0x2a1   : > { %1959 = vmatprep.mubr.msk.f32.mxu1 %vm2262_vm1, %v2261_v4 }
 0x2a3   : > { %v604_v44 = vpop.permute.xlu1 %603  ;;  %v481_v45 = vpop.permute.xlu0 %480 }
 0x2a4   : > { %v483_v46 = vsub.f32 %v473_v43, %v481_v45  ;;  %1958 = vmatpush3.xpose.msk.msra.mxu1 %vm527_vm2, %v604_v44 }
 0x2a5   : > { %1962 = vmatprep.subr.mxu1 %v2261_v4 }
 0x2a7   : > { %v800_v47 = vpop.permute.xlu1 %799  ;;  %1960 = vmatmul.mubr.msk.f32.vlgmr.msra.gmra.mxu1 %vm527_vm2, %v483_v46  ;;  %v813_v49 = vpop.permute.xlu0 %812 }
 0x2a8   : > { %v802_v48 = vmul.f32 %v800_v47, %v2509_v19  ;;  %1964 = vmatprep.mubr.msk.f32.mxu1 %vm2262_vm1, %v2261_v4  ;;  %v815_v50 = vmul.f32 %v813_v49, %v2509_v19 }
 0x2aa   : > { %804 = vrot.lane.b32.xlu0 %v802_v48, %s2266_s18 }
 0x2ab   : > { %v774_v51 = vpop.permute.xlu0 %773 }
 0x2ac   : > { %v776_v52 = vmul.f32 %v774_v51, %v2513_v23 }
 0x2ae   : > { %817 = vrot.lane.b32.xlu0 %v815_v50, %s2265_s28 }
 0x2af   : > { %v787_v57 = vpop.permute.xlu0 %786 }
 0x2b0   : > { %v789_v63 = vmul.f32 %v787_v57, %v2513_v23 }
 0x2b2   : > { %769 = vrot.lane.b32.xlu0 %v2490_v9, %s2272_s22 }
 0x2b3   : > { %v796_v60 = vpop.permute.xlu0 %795 }
 0x2b4   : > { %v798_v5 = vmul.f32 %v796_v60, %v2509_v19 }
 0x2b6   : > { %782 = vrot.lane.b32.xlu0 %v2490_v9, %s2271_s27  ;;  %s2282_s27 = smov 56  }
 0x2b7   : > { %v809_v61 = vpop.permute.xlu0 %808 }
 0x2b8   : > { %v811_v2 = vmul.f32 %v809_v61, %v2509_v19 }
 0x2ba   : > { %778 = vrot.lane.b32.xlu0 %v776_v52, %s2266_s18 }
 0x31c   : > { %v805_v62 = vpop.permute.xlu0 %804 }
 0x31d   : > { %v807_v6 = vsub.f32 %v798_v5, %v805_v62 }
 0x320   : > { %v818_v1 = vpop.permute.xlu0 %817 }
 0x321   : > { %v820_v3 = vadd.f32 %v818_v1, %v811_v2 }
 0x324   : > { %v770_v7 = vpop.permute.xlu0 %769 }
 0x325   : > { %v772_v25 = vmul.f32 %v770_v7, %v2513_v23 }
 0x328   : > { %v783_v10 = vpop.permute.xlu0 %782 }
 0x329   : > { %v785_v13 = vmul.f32 %v783_v10, %v2513_v23 }
 0x32c   : > { %v779_v24 = vpop.permute.xlu0 %778 }
 0x32d   : > { %v781_v26 = vsub.f32 %v772_v25, %v779_v24 }
 0x360   : > { %v598_v53 = vpop.f32.mrf.mxu1 }
 0x362   : > { %v1956_v54 = vpop.f32.mrf.mxu1 }
 0x367   : > { %v676_v55 = vpop.f32.mrf.mxu1 }
 0x368   : > { %v677_v56 = vadd.f32 %v676_v55, %v598_v53 }
 0x369   : > { %v1961_v58 = vpop.f32.mrf.mxu1 }
 0x36a   : > { %v681_v59 = vsel %vm680_vm3, %v677_v56, -inf }
 0x36b   : > { %682 = vmax.xlane.f32.xlu1 %v681_v59 }
 0x37c   : > { %791 = vrot.lane.b32.xlu1 %v789_v63, %s2265_s28 }
 0x380   : > { %693 = vrot.lane.b32.xlu1 %v2509_v19, %s2273_s23  ;;  %s2283_s23 = smov 76  }
 0x384   : > { %825 = vrot.lane.b32.xlu1 %v820_v3, %s2274_s25  ;;  %s2284_s25 = smov 80  }
 0x388   : > { %905 = vrot.lane.b32.xlu1 %v807_v6, %s2275_s24  ;;  %s2285_s24 = smov 108  }
 0x3f4   : > { %v683_v11 = vpop.xlane.xlu1 %682 }
 0x3f5   : > { %v684_v12 = vsub.f32 %v677_v56, %v683_v11 }
 0x3f7   : > { %v685_v14 = vmul.f32 1.442695, %v684_v12 }
 0x3f8   : > { %v792_v15 = vpop.permute.xlu1 %791 }
 0x3f9   : > { %2117 = vpow2.f32 %v685_v14  ;;  %v794_v16 = vadd.f32 %v792_v15, %v785_v13 }
 0x3fb   : > { %822 = vrot.lane.b32.xlu1 %v794_v16, %s2276_s20  ;;  %s2286_s20 = smov 112  }
 0x3fc   : > { %v694_v17 = vpop.permute.xlu1 %693 }
 0x3fd   : > { %1963 = vmatpush3.msra.mxu1 %v694_v17 }
 0x3fe   : > { %1967 = vmatprep.subr.mxu1 %v2261_v4 }
 0x3ff   : > { %1098 = vrot.lane.b32.xlu1 %v2484_v8, %s2277_s21 }
 0x400   : > { %v826_v18 = vpop.permute.xlu1 %825 }
 0x403   : > { %1111 = vrot.lane.b32.xlu1 %v2484_v8, %s2278_s19 }
 0x404   : > { %v906_v20 = vpop.permute.xlu1 %905 }
 0x405   : > { %1973 = vmatpush3.xpose.msk.msra.mxu0 %vm527_vm2, %v906_v20 }
 0x406   : > { %v2118_v21 = vpop.eup %2117  ;;  %1982 = vmatprep.subr.mxu0 %v2261_v4 }
 0x407   : > { %v687_v22 = vsel %vm680_vm3, %v2118_v21, 0.0 }
 0x408   : > { %688 = vadd.xlane.f32.xlu0 %v687_v22 }
 0x41e   : > { %902 = vrot.lane.b32.xlu0 %v781_v26, %s2279_s2  ;;  %s2288_s2 = smov 28  }
 0x422   : > { %1072 = vrot.lane.b32.xlu0 %v2484_v8, %s2280_s29 }
 0x426   : > { %1085 = vrot.lane.b32.xlu0 %v2484_v8, %s2281_s15 }
 0x42a   : > { %1094 = vrot.lane.b32.xlu0 %v2490_v9, %s2278_s19 }
 0x42e   : > { %1107 = vrot.lane.b32.xlu0 %v2490_v9, %s2277_s21  ;;  %s2287_s21 = smov 60  }
 0x46d   : > { %v823_v27 = vpop.permute.xlu1 %822 }
 0x471   : > { %v1099_v28 = vpop.permute.xlu1 %1098 }
 0x472   : > { %v1101_v29 = vmul.f32 %v1099_v28, %v2509_v19 }
 0x474   : > { %1103 = vrot.lane.b32.xlu0 %v1101_v29, %s2266_s18 }
 0x475   : > { %v1112_v30 = vpop.permute.xlu1 %1111 }
 0x476   : > { %v1114_v31 = vmul.f32 %v1112_v30, %v2509_v19 }
 0x478   : > { %1116 = vrot.lane.b32.xlu0 %v1114_v31, %s2265_s28 }
 0x47c   : > { %1081 = vrot.lane.b32.xlu0 %v2490_v9, %s2280_s29  ;;  %s2289_s29 = smov 24  }
 0x491   : > { %v689_v32 = vpop.xlane.xlu0 %688 }
 0x492   : > { %2119 = vrcp.f32 %v689_v32 }
 0x495   : > { %v903_v33 = vpop.permute.xlu0 %902 }
 0x496   : > { %1975 = vmatmul.mubr.msk.f32.vlgmr.msra.gmra.mxu0 %vm527_vm2, %v903_v33 }
 0x497   : > { %1984 = vmatprep.mubr.msk.f32.mxu0 %vm2262_vm1, %v2261_v4 }
 0x499   : > { %v1073_v34 = vpop.permute.xlu0 %1072 }
 0x49a   : > { %v1075_v35 = vmul.f32 %v1073_v34, %v2513_v23 }
 0x49c   : > { %1077 = vrot.lane.b32.xlu0 %v1075_v35, %s2266_s18 }
 0x49d   : > { %v1086_v36 = vpop.permute.xlu0 %1085 }
 0x49e   : > { %v1088_v37 = vmul.f32 %v1086_v36, %v2513_v23 }
 0x49f   : > { %v2120_v38 = vpop.eup %2119 }
 0x4a0   : > { %1090 = vrot.lane.b32.xlu0 %v1088_v37, %s2265_s28  ;;  %v691_v39 = vmul.f32 %v2120_v38, %v2118_v21 }
 0x4a1   : > { %v1095_v44 = vpop.permute.xlu0 %1094 }
 0x4a2   : > { %1965 = vmatmul.mubr.msk.f32.vlgmr.msra.gmra.mxu1 %vm680_vm3, %v691_v39  ;;  %v1097_v56 = vmul.f32 %v1095_v44, %v2509_v19 }
 0x4a3   : > { %1968 = vmatpush3.xpose.msk.msra.mxu1 %vm527_vm2, %v826_v18  ;;  %1969 = vmatprep.mubr.msk.f32.mxu1 %vm2262_vm1, %v2261_v4 }
 0x4a4   : > { %1977 = vmatprep.subr.mxu1 %v2261_v4 }
 0x4a5   : > { %v1108_v49 = vpop.permute.xlu0 %1107 }
 0x4a6   : > { %1970 = vmatmul.mubr.msk.f32.vlgmr.msra.gmra.mxu1 %vm527_vm2, %v823_v27  ;;  %v1110_v53 = vmul.f32 %v1108_v49, %v2509_v19 }
 0x4a7   : > { %1979 = vmatprep.mubr.msk.f32.mxu1 %vm2262_vm1, %v2261_v4 }
 0x4e6   : > { %v1104_v50 = vpop.permute.xlu0 %1103 }
 0x4e7   : > { %v1106_v57 = vsub.f32 %v1097_v56, %v1104_v50 }
 0x4ea   : > { %v1117_v51 = vpop.permute.xlu0 %1116 }
 0x4eb   : > { %v1119_v55 = vadd.f32 %v1117_v51, %v1110_v53 }
 0x4ee   : > { %v1082_v52 = vpop.permute.xlu0 %1081 }
 0x4ef   : > { %v1084_v59 = vmul.f32 %v1082_v52, %v2513_v23 }
 0x50e   : > { %v1078_v54 = vpop.permute.xlu0 %1077 }
 0x512   : > { %v1091_v58 = vpop.permute.xlu0 %1090 }
 0x513   : > { %v1093_v60 = vadd.f32 %v1091_v58, %v1084_v59 }
 0x556   : > { %v977_v40 = vpop.f32.mrf.mxu0 }
 0x558   : > { %v1976_v41 = vpop.f32.mrf.mxu0 }
 0x562   : > { %v2598_v42 = vpop.f32.mrf.mxu1 }
 0x564   : > { %v1966_v43 = vpop.f32.mrf.mxu1 }
 0x566   : > { %v897_v45 = vpop.f32.mrf.mxu1 }
 0x567   : > { %v978_v46 = vadd.f32 %v977_v40, %v897_v45 }
 0x568   : > { %v1971_v47 = vpop.f32.mrf.mxu1 }
 0x569   : > { %v981_v48 = vsel %vm680_vm3, %v978_v46, -inf }
 0x56a   : > { %982 = vmax.xlane.f32.xlu1 %v981_v48 }
 0x57b   : > { %1068 = vrot.lane.b32.xlu1 %v2490_v9, %s2281_s15 }
 0x57f   : > { %992 = vrot.lane.b32.xlu1 %v2509_v19, %s2282_s27 }
 0x583   : > { %1124 = vrot.lane.b32.xlu1 %v1119_v55, %s2283_s23 }
 0x587   : > { %1204 = vrot.lane.b32.xlu1 %v1106_v57, %s2284_s25 }
 0x58b   : > { %1121 = vrot.lane.b32.xlu1 %v1093_v60, %s2285_s24 }
 0x5f3   : > { %v983_v61 = vpop.xlane.xlu1 %982 }
 0x5f4   : > { %v984_v62 = vsub.f32 %v978_v46, %v983_v61 }
 0x5f6   : > { %v985_v63 = vmul.f32 1.442695, %v984_v62 }
 0x5f7   : > { %v1069_v1 = vpop.permute.xlu1 %1068 }
 0x5f8   : > { %2121 = vpow2.f32 %v985_v63  ;;  %v1071_v2 = vmul.f32 %v1069_v1, %v2513_v23 }
 0x5fa   : > { %v1080_v3 = vsub.f32 %v1071_v2, %v1078_v54 }
 0x5fb   : > { %v993_v5 = vpop.permute.xlu1 %992 }
 0x5fc   : > { %1978 = vmatpush3.msra.mxu1 %v993_v5  ;;  %1201 = vrot.lane.b32.xlu1 %v1080_v3, %s2286_s20 }
 0x5fd   : > { %1987 = vmatprep.subr.mxu1 %v2261_v4 }
 0x5ff   : > { %v1125_v6 = vpop.permute.xlu1 %1124 }
 0x600   : > { %1983 = vmatpush3.xpose.msk.msra.mxu0 %vm527_vm2, %v1125_v6  ;;  %1397 = vrot.lane.b32.xlu1 %v2484_v8, %s2287_s21 }
 0x601   : > { %1992 = vmatprep.subr.mxu0 %v2261_v4 }
 0x603   : > { %v1205_v7 = vpop.permute.xlu1 %1204 }
 0x604   : > { %1410 = vrot.lane.b32.xlu1 %v2484_v8, %s2282_s27 }
 0x605   : > { %v2122_v10 = vpop.eup %2121 }
 0x606   : > { %v987_v11 = vsel %vm680_vm3, %v2122_v10, 0.0 }
 0x607   : > { %988 = vadd.xlane.f32.xlu0 %v987_v11  ;;  %v1122_v12 = vpop.permute.xlu1 %1121 }
 0x608   : > { %1371 = vrot.lane.b32.xlu1 %v2484_v8, %s2288_s2  ;;  %1985 = vmatmul.mubr.msk.f32.vlgmr.msra.gmra.mxu0 %vm527_vm2, %v1122_v12 }
 0x609   : > { %1994 = vmatprep.mubr.msk.f32.mxu0 %vm2262_vm1, %v2261_v4 }
 0x60c   : > { %1393 = vrot.lane.b32.xlu1 %v2490_v9, %s2282_s27  ;;  %s2291_s27 = smov 72  }
 0x610   : > { %1406 = vrot.lane.b32.xlu1 %v2490_v9, %s2287_s21 }
 0x66e   : > { %v1202_v13 = vpop.permute.xlu1 %1201 }
 0x672   : > { %v1398_v14 = vpop.permute.xlu1 %1397 }
 0x673   : > { %v1400_v15 = vmul.f32 %v1398_v14, %v2509_v19 }
 0x675   : > { %1402 = vrot.lane.b32.xlu1 %v1400_v15, %s2266_s18 }
 0x676   : > { %v1411_v16 = vpop.permute.xlu1 %1410 }
 0x677   : > { %v1413_v17 = vmul.f32 %v1411_v16, %v2509_v19 }
 0x679   : > { %1415 = vrot.lane.b32.xlu1 %v1413_v17, %s2265_s28 }
 0x67a   : > { %v1372_v30 = vpop.permute.xlu1 %1371 }
 0x67b   : > { %v1374_v31 = vmul.f32 %v1372_v30, %v2513_v23  ;;  %v1900_v30 = vld [vmem:[%s2747_s7] ss:$0 sm:$0xff] }
 0x67d   : > { %1367 = vrot.lane.b32.xlu1 %v2490_v9, %s2289_s29 }
 0x67e   : > { %v1394_v32 = vpop.permute.xlu1 %1393 }
 0x67f   : > { %v1396_v43 = vmul.f32 %v1394_v32, %v2509_v19 }
 0x681   : > { %1380 = vrot.lane.b32.xlu1 %v2490_v9, %s2288_s2 }
 0x682   : > { %v1407_v33 = vpop.permute.xlu1 %1406 }
 0x683   : > { %v1409_v41 = vmul.f32 %v1407_v33, %v2509_v19 }
 0x690   : > { %v989_v18 = vpop.xlane.xlu0 %988 }
 0x691   : > { %2123 = vrcp.f32 %v989_v18 }
 0x69e   : > { %v2124_v20 = vpop.eup %2123 }
 0x69f   : > { %v991_v21 = vmul.f32 %v2124_v20, %v2122_v10  ;;  %v471_v20 = vld [vmem:[%s2746_s6 + $0x18] sm:$0xff] }
 0x6a1   : > { %1980 = vmatmul.mubr.msk.f32.vlgmr.msra.gmra.mxu1 %vm680_vm3, %v991_v21  ;;  %v470_v21 = vld [vmem:[%s2746_s6 + $0x10] sm:$0xff] }
 0x6a2   : > { %1988 = vmatpush3.xpose.msk.msra.mxu1 %vm527_vm2, %v1205_v7  ;;  %1989 = vmatprep.mubr.msk.f32.mxu1 %vm2262_vm1, %v2261_v4 }
 0x6a3   : > { %1997 = vmatprep.subr.mxu1 %v2261_v4 }
 0x6a5   : > { %1990 = vmatmul.mubr.msk.f32.vlgmr.msra.gmra.mxu1 %vm527_vm2, %v1202_v13 }
 0x6a6   : > { %1999 = vmatprep.mubr.msk.f32.mxu1 %vm2262_vm1, %v2261_v4 }
 0x6c8   : > { %v1196_v22 = vpop.f32.mrf.mxu0 }
 0x6ca   : > { %v1986_v9 = vpop.f32.mrf.mxu0 }
 0x6e7   : > { %v1403_v37 = vpop.permute.xlu1 %1402 }
 0x6e8   : > { %v1405_v44 = vsub.f32 %v1396_v43, %v1403_v37 }
 0x6eb   : > { %v1416_v40 = vpop.permute.xlu1 %1415 }
 0x6ef   : > { %v1368_v47 = vpop.permute.xlu1 %1367 }
 0x6f0   : > { %v1370_v53 = vmul.f32 %v1368_v47, %v2513_v23 }
 0x6f3   : > { %v1381_v48 = vpop.permute.xlu1 %1380 }
 0x6f4   : > { %v1383_v49 = vmul.f32 %v1381_v48, %v2513_v23 }
 0x761   : > { %v2638_v24 = vpop.f32.mrf.mxu1 }
 0x763   : > { %v1981_v25 = vpop.f32.mrf.mxu1 }
 0x765   : > { %v1276_v26 = vpop.f32.mrf.mxu1 }
 0x766   : > { %v1277_v27 = vadd.f32 %v1276_v26, %v1196_v22  ;;  %v468_v22 = vld [vmem:[%s2746_s6] sm:$0xff] }
 0x767   : > { %v1991_v28 = vpop.f32.mrf.mxu1 }
 0x768   : > { %v1280_v29 = vsel %vm680_vm3, %v1277_v27, -inf }
 0x769   : > { %1281 = vmax.xlane.f32.xlu0 %v1280_v29 }
 0x77f   : > { %1384 = vrot.lane.b32.xlu0 %v2484_v8, %s2289_s29  ;;  %v1418_v8 = vadd.f32 %v1416_v40, %v1409_v41 }
 0x783   : > { %1376 = vrot.lane.b32.xlu0 %v1374_v31, %s2266_s18  ;;  %s2290_s18 = smov 68   ;;  %v1902_v31 = vld [vmem:[%s2748_s8] ss:$0 sm:$0xff] }
 0x7f2   : > { %v1282_v34 = vpop.xlane.xlu0 %1281 }
 0x7f3   : > { %v1283_v35 = vsub.f32 %v1277_v27, %v1282_v34 }
 0x7f5   : > { %v1284_v36 = vmul.f32 1.442695, %v1283_v35 }
 0x7f6   : > { %v1385_v38 = vpop.permute.xlu0 %1384 }
 0x7f7   : > { %2125 = vpow2.f32 %v1284_v36  ;;  %v1387_v39 = vmul.f32 %v1385_v38, %v2513_v23 }
 0x7f9   : > { %1389 = vrot.lane.b32.xlu1 %v1387_v39, %s2265_s28  ;;  %s2292_s28 = smov 100  }
 0x7fa   : > { %v1377_v52 = vpop.permute.xlu0 %1376 }
 0x7fb   : > { %v1379_v55 = vsub.f32 %v1370_v53, %v1377_v52 }
 0x7fd   : > { %1291 = vrot.lane.b32.xlu1 %v2509_v19, %s2278_s19  ;;  %s2293_s19 = smov 104  }
 0x801   : > { %1423 = vrot.lane.b32.xlu1 %v1418_v8, %s2290_s18 }
 0x804   : > { %v2126_v45 = vpop.eup %2125 }
 0x805   : > { %1503 = vrot.lane.b32.xlu1 %v1405_v44, %s2291_s27  ;;  %v1286_v46 = vsel %vm680_vm3, %v2126_v45, 0.0 }
 0x806   : > { %1287 = vadd.xlane.f32.xlu0 %v1286_v46 }
 0x86b   : > { %v1390_v50 = vpop.permute.xlu1 %1389 }
 0x86c   : > { %v1392_v51 = vadd.f32 %v1390_v50, %v1383_v49 }
 0x86e   : > { %1420 = vrot.lane.b32.xlu1 %v1392_v51, %s2292_s28  ;;  %s1904_s28 = sshll.u32 %s2366_s13, 7  ;;  %s2294_s13 = smov [#allocation7]  }
 0x86f   : > { %v1292_v54 = vpop.permute.xlu1 %1291  ;;  %s1785_s24 = scalar_lea.hbm %s2749_s9, %s1904_s28  ;;  %s2191_s20 = sshll.u32 %s2294_s13, 4  ;;  %s2192_s20 = int_to_ptr.vmem [resolvable:$false] %s2191_s20 }
 0x870   : > { %1993 = vmatpush3.msra.mxu0 %v1292_v54 }
 0x871   : > { %2002 = vmatprep.subr.mxu0 %v2261_v4 }
 0x872   : > { %1500 = vrot.lane.b32.xlu1 %v1379_v55, %s2293_s19  ;;  %s362_s19 = scalar_lea.vmem [#allocation7], %s1874_s16  ;;  %s2193_s16 = scalar_lea.vmem %s2192_s20, 256 }
 0x873   : > { %v1424_v56 = vpop.permute.xlu1 %1423 }
 0x874   : > { %1998 = vmatpush3.xpose.msk.msra.mxu1 %vm527_vm2, %v1424_v56 }
 0x875   : > { %2007 = vmatprep.subr.mxu1 %v2261_v4 }
 0x877   : > { %v1504_v60 = vpop.permute.xlu1 %1503 }
 0x88f   : > { %v1288_v57 = vpop.xlane.xlu0 %1287 }
 0x890   : > { %2127 = vrcp.f32 %v1288_v57 }
 0x89d   : > { %v2128_v58 = vpop.eup %2127 }
 0x89e   : > { %v1290_v59 = vmul.f32 %v2128_v58, %v2126_v45 }
 0x8a0   : > { %1995 = vmatmul.mubr.msk.f32.vlgmr.msra.gmra.mxu0 %vm680_vm3, %v1290_v59 }
 0x8a1   : > { %2003 = vmatpush3.xpose.msk.msra.mxu0 %vm527_vm2, %v1504_v60  ;;  %2004 = vmatprep.mubr.msk.f32.mxu0 %vm2262_vm1, %v2261_v4 }
 0x8a2   : > { %2012 = vmatprep.subr.mxu0 %v2261_v4 }
 0x8e0   : > { %v1421_v23 = vpop.permute.xlu1 %1420 }
 0x8e1   : > { %2000 = vmatmul.mubr.msk.f32.vlgmr.msra.gmra.mxu1 %vm527_vm2, %v1421_v23 }
 0x8e2   : > { %2009 = vmatprep.mubr.msk.f32.mxu1 %vm2262_vm1, %v2261_v4 }
 0x8e4   : > { %v1501_v61 = vpop.permute.xlu1 %1500 }
 0x8e5   : > { %2005 = vmatmul.mubr.msk.f32.vlgmr.msra.gmra.mxu0 %vm527_vm2, %v1501_v61 }
 0x8e6   : > { %2020 = vmatprep.mubr.msk.f32.mxu0 %vm2262_vm1, %v2261_v4  ;;  %2013 = vmatpush3.msra.mxu0 %v471_v20 }
 0x8e7   : > { %2014 = vmatprep.subr.mxu0 %v2261_v4 }
 0x8e8   : > { %2015 = vmatpush3.msra.mxu0 %v470_v21 }
 0x8e9   : > { %2016 = vmatprep.subr.mxu0 %v2261_v4 }
 0x960   : > { %v1363_v62 = vpop.f32.mrf.mxu0 }
 0x962   : > { %v1996_v63 = vpop.f32.mrf.mxu0 }
 0x9a1   : > { %v1495_v1 = vpop.f32.mrf.mxu1 }
 0x9a3   : > { %v2001_v2 = vpop.f32.mrf.mxu1 }
 0x9a5   : > { %v1575_v3 = vpop.f32.mrf.mxu0 }
 0x9a6   : > { %v1576_v5 = vadd.f32 %v1575_v3, %v1495_v1 }
 0x9a7   : > { %v2006_v6 = vpop.f32.mrf.mxu0 }
 0x9a8   : > { %v1579_v7 = vsel %vm680_vm3, %v1576_v5, -inf }
 0x9a9   : > { %1580 = vmax.xlane.f32.xlu1 %v1579_v7 }
 0x9ba   : > { %1671 = vrot.lane.b32.xlu1 %v1363_v62, %s2281_s15  ;;  %s1787_s15 = sshll.u32 %s362_s19, 4  ;;  %s1788_s15 = int_to_ptr.vmem [resolvable:$true] %s1787_s15 }
 0x9bb   : > { %p2194_p10 = scmp.lt.s32.totalorder %s1788_s15, %s2192_s20 }
 0xa32   : > { %v1581_v10 = vpop.xlane.xlu1 %1580 }
 0xa33   : > { %v1582_v11 = vsub.f32 %v1576_v5, %v1581_v10 }
 0xa35   : > { %v1583_v12 = vmul.f32 1.442695, %v1582_v11 }
 0xa36   : > { %v1672_v27 = vpop.permute.xlu1 %1671 }
 0xa37   : > { %2129 = vpow2.f32 %v1583_v12 }
 0xa44   : > { %v2130_v13 = vpop.eup %2129 }
 0xa45   : > { %v1585_v14 = vsel %vm680_vm3, %v2130_v13, 0.0 }
 0xa46   : > { %1586 = vadd.xlane.f32.xlu0 %v1585_v14 }
 0xa5c   : > { %1590 = vrot.lane.b32.xlu0 %v2509_v19, %s2270_s17  ;;  %v469_v19 = vld [vmem:[%s2746_s6 + $0x8] sm:$0xff]  ;;  %s1774_s17 = scalar_lea.sflag [#allocation4], %s2452_s26 }
 0xa5d   : > { %2017 = vmatpush3.msra.mxu0 %v469_v19 }
 0xa5e   : > { %2018 = vmatprep.subr.mxu0 %v2261_v4 }
 0xa5f   : > { %2019 = vmatpush3.msra.mxu0 %v468_v22 }
 0xa60   : > { %1667 = vrot.lane.b32.xlu0 %v2638_v24, %s2272_s22  ;;  %s2187_s22 = scalar_lea.vmem %s1788_s15, 128 }
 0xa61   : > { %p2188_p8 = scmp.ne.s32.totalorder %s1788_s15, %s2187_s22  ;;  %p2195_p2 = scmp.lt.s32.totalorder %s2193_s16, %s2187_s22 }
 0xa63   : > { %p2189_p11 = pnand %p2188_p8, %p2773_p3  ;;  %p2196_p13 = por %p2195_p2, %p2194_p10 }
 0xa65   : > { %p2190_p7 = pneg %p2189_p11 }
 0xa67   : > { %p2197_p0 = pnand %p2196_p13, %p2190_p7 }
 0xacf   : > { %v1587_v15 = vpop.xlane.xlu0 %1586 }
 0xad0   : > { %2131 = vrcp.f32 %v1587_v15 }
 0xad3   : > { %v1591_v16 = vpop.permute.xlu0 %1590 }
 0xad4   : > { %2008 = vmatpush3.msra.mxu1 %v1591_v16 }
 0xad7   : > { %v1668_v25 = vpop.permute.xlu0 %1667 }
 0xad8   : > { %v1678_v26 = vsel %vm680_vm3, %v2598_v42, %v1668_v25 }
 0xad9   : > { %v1680_v28 = vsel %vm1679_vm4, %v1678_v26, %v1672_v27 }
 0xadd   : > { %v2132_v17 = vpop.eup %2131 }
 0xade   : > { %v1589_v18 = vmul.f32 %v2132_v17, %v2130_v13 }
 0xae0   : > { %2010 = vmatmul.mubr.msk.f32.vlgmr.msra.gmra.mxu1 %vm680_vm3, %v1589_v18 }
 0xba0   : > { %v1662_v9 = vpop.f32.mrf.mxu1 }
 0xba1   : > { %1675 = vrot.lane.b32.xlu0 %v1662_v9, %s2289_s29 }
 0xba2   : > { %v2011_v24 = vpop.f32.mrf.mxu1 }
 0xc13   : > { %v1676_v4 = vpop.permute.xlu0 %1675 }
 0xc14   : > { %v1682_v29 = vsel %vm1681_vm5, %v1680_v28, %v1676_v4 }
 0xc15   : > { %2021 = vmatmul.mubr.msk.f32.vlgmr.msra.gmra.mxu0 %vm366_vm0, %v1682_v29 }
 0xcd5   : > { %v1760_v32 = vpop.f32.mrf.mxu0 }
 0xcd6   : > { %v1761_v42 = vadd.f32 %v1900_v30, %v1760_v32 }
 0xcd7   : > { %v2022_v33 = vpop.f32.mrf.mxu0 }
 0xcd8   : > { %v1770_v34 = vmul.f32 %v1902_v31, %v1761_v42 }
 0xcda   : > { %v1771_v35 = vadd.f32 %v1770_v34, %v2466_v0 }
 0xcdc   : > { %1772 = vst.msk [vmem:[%s362_s19] sm:$0xff] %vm366_vm0, %v1771_v35 }
 0xcdd   : > { %2200 = shalt.err (!%p2197_p0)
}
 0xcde   : > { %s2201_s21 = scalar_lea.hbm %s1785_s24, 128  ;;  %s2205_s18 = scalar_lea.hbm %s2749_s9, 256 }
 0xcdf   : > { %p2202_p5 = scmp.ne.s32.totalorder %s1785_s24, %s2201_s21  ;;  %p2206_p1 = scmp.lt.s32.totalorder %s1785_s24, %s2749_s9 }
 0xce0   : > { %p2207_p4 = scmp.lt.s32.totalorder %s2205_s18, %s2201_s21 }
 0xce1   : > { %p2203_p9 = pnand %p2202_p5, %p2773_p3 }
 0xce2   : > { %p2208_p6 = por %p2207_p4, %p2206_p1 }
 0xce3   : > { %p2204_p12 = pneg %p2203_p9 }
 0xce5   : > { %p2209_p8 = pnand %p2208_p6, %p2204_p12 }
 0xce7   : > { %2212 = shalt.err (!%p2209_p8)
}
 0xce8   : > { %2029 = dma.vmem_to_hbm [thread:$0]  (%p2773_p3), %s1788_s15, 128, %s1785_s24, %s1774_s17  }
 0xce9 PF: > { %s2774_s28 = sld [smem:[#allocation11_spill]]  ;;  %s1799_s19 = sand.u32 1, %s2243_s30  }
 0xcea   : > { %p2776_p7 = scmp.ge.s32.totalorder %s2255_s12, 2  ;;  %s1800_s23 = scalar_lea.sflag [#allocation4], %s1799_s19 }
 0xcef   : > { %p2775_p11 = scmp.ne.s32.totalorder %s2774_s28, 0 }
 0xcf1   : > { %p2040_p10 = pnand %p2776_p7, %p2775_p11 }
 0xcf3   : > { %p2041_p2 = pneg %p2040_p10 }
 0xcf5   : > { %2238 = dma.done.wait (%p2041_p2), %s1800_s23, 128  }
 0xcf6   : > { %2240 = vsyncadd (%p2041_p2), %s1800_s23, 4294967168  ;;  %s2777_s12 = sld [smem:[#allocation12_spill]]  ;;  %s2779_s30 = smov %s2247_s10 }
 0xcf7   : > { %s2778_s25 = sld [smem:[#allocation13_spill]]  ;;  %s2780_s10 = smov %s2251_s11 }
 0xcfc   : > { %p23_p13 = scmp.ge.s32.totalorder %s2777_s12, 4  }
 0xcfd   : > { %s2781_s11 = smov %s2778_s25 }
 0xcfe   :  { %25 = sbr.rel (!%p23_p13) target bundleno = 8 (0x8), region = 105 }
 0xd03   :  { %1805 = vsyncpa [#allocation3], 1 }
 0xd04   :  { %1807 = vsyncpa [#allocation3 + $0x1], 1 }
 0xd05   :  { %1808 = vsyncpa [#allocation6], 1 }
 0xd06   :  { %1809 = vsyncpa [#allocation4], 1 }
 0xd07   :  { %1811 = vsyncpa [#allocation4 + $0x1], 1 }

</bundles_post_ra>
